<compile_context>
chip_gen: v6e
topology: v6e:2x2x1
jax: 0.10.0
libtpu: 0.0.40
codegen_flags: <defaults>
</compile_context>

<pallas_src>
import functools

import jax
import jax.numpy as jnp
from jax.experimental import pallas as pl
from jax.experimental.pallas import tpu as pltpu

F32 = jnp.float32
C_MID = 128  # conv1 output channels (fixed by the module) == TPU lane width


# --------------------------------------------------------------------------
# Pallas kernel: fused 3x3 conv + ReLU -> spatial sum -> 1x1 head -> softmax
# -> expectation -> clamp.  Grid: (batch, row tiles).  The (8,128) accumulator
# lives in VMEM scratch and persists over the (innermost) tile axis.
# --------------------------------------------------------------------------
def _head_kernel(xb_ref, w1_ref, b1_ref, w2_ref, b2_ref, o_ref, acc_ref,
                 *, tr, h, w, c_in, inv_hw, min_scale):
    t = pl.program_id(1)
    n_px = tr * w

    @pl.when(t == 0)
    def _init():
        acc_ref[...] = jnp.zeros_like(acc_ref)

    x = xb_ref[...]                                       # (TR+2, W+2, C) bf16

    # 3x3 conv = nine shifted (TR*W, C_in) @ (C_in, 128) MXU dots, f32 accum.
    y = jnp.zeros((n_px, C_MID), dtype=F32)
    for dy in range(3):
        for dx in range(3):
            tap = x[dy:dy + tr, dx:dx + w, :].reshape(n_px, c_in)
            y = y + jnp.dot(tap, w1_ref[dy * 3 + dx],
                            preferred_element_type=F32)
    y = jnp.maximum(y + b1_ref[...], 0.0)                 # bias + ReLU (f32)

    # Mask pixels beyond the last valid image row (the tail tile is
    # zero-padded, and relu(b1) != 0 would otherwise pollute the sum).
    rows_valid = jnp.minimum(tr, h - t * tr)
    pix = jax.lax.broadcasted_iota(jnp.int32, (n_px, 1), 0)
    y = jnp.where(pix < rows_valid * w, y, 0.0)

    # Per-tile reduction = pure VPU adds into (8,128) scratch; the single
    # cross-sublane (XLU) reduce happens once per batch in the finalize block.
    acc_ref[...] += jnp.sum(y.reshape(n_px // 8, 8, C_MID), axis=0)

    @pl.when(t == pl.num_programs(1) - 1)
    def _finalize():
        # global average pool over all H*W pixels
        pooled = jnp.sum(acc_ref[...], axis=0, keepdims=True) * inv_hw  # (1,128)
        # 1x1 conv head, commuted past the pooling (exact: it is linear)
        logits = jnp.dot(pooled, w2_ref[...],
                         preferred_element_type=F32) + b2_ref[...]      # (1, S)
        # softmax over the S scale bins
        m = jnp.max(logits, axis=-1, keepdims=True)
        e = jnp.exp(logits - m)
        probs = e / jnp.sum(e, axis=-1, keepdims=True)
        # expected scale = sum_s s * p_s, clamped below
        scales = jax.lax.broadcasted_iota(jnp.int32, probs.shape, 1).astype(F32)
        expected = jnp.sum(probs * scales, axis=-1, keepdims=True)      # (1,1)
        o_ref[...] = jnp.maximum(expected, min_scale).astype(o_ref.dtype)


def _pick_row_tile(h, w, c_in, target_px=4096, vmem_budget=20 * 1024 * 1024):
    """Rows per spatial tile.

    Multiple of 8 so TR*W % 8 == 0 (needed for the (8,128) accumulator
    reshape), targeting ~4K pixels/tile (per-grid-step overhead ~0.35us, HBM
    roofline plateaus ~1K+ rows), capped by a VMEM budget covering the
    double-buffered bf16 input block plus the f32 (TR*W, 128) conv temp
    (v7x has only 64 MiB VMEM / 32 MiB scoped default).
    """
    max_rows = -(-h // 8) * 8                      # round_up(h, 8)
    tr = max(8, min(max_rows, (max(8, target_px // w) // 8) * 8))

    def bytes_needed(r):
        x_blk = (r + 2) * (w + 2) * c_in * 2       # bf16 input block
        y_tmp = r * w * C_MID * 4                  # f32 conv temp
        return 2 * x_blk + y_tmp

    while tr > 8 and bytes_needed(tr) > vmem_budget:
        tr -= 8
    return tr


# --------------------------------------------------------------------------
# Wrapper: NCHW -> NHWC + 1-px pad + halo row-blocks (no 9x im2col), then one
# pallas_call for the whole head.
# --------------------------------------------------------------------------
def prob_scale_head_pallas(x_nchw, params, *, max_scale=10, min_scale=0.01,
                           compute_dtype=jnp.bfloat16, row_tile=None):
    b, c_in, h, w = x_nchw.shape
    s = max_scale + 1
    hw = h * w

    if row_tile is None:
        tr = _pick_row_tile(h, w, c_in)
    else:
        assert row_tile % 8 == 0, "row_tile must be a multiple of 8"
        tr = row_tile
    n_tiles = -(-h // tr)                          # cdiv(h, tr)

    # NCHW -> NHWC (+1-pixel zero pad), bf16 stream for the MXU.
    xp = jnp.pad(jnp.transpose(x_nchw, (0, 2, 3, 1)).astype(compute_dtype),
                 ((0, 0), (1, 1), (1, 1), (0, 0)))
    # Zero-pad rows so every tile can carry its own 1-row halo, then stack
    # (TR+2)-row blocks (duplicates only 2 halo rows per tile: ~1% traffic).
    pad_rows = n_tiles * tr + 2 - (h + 2)
    if pad_rows:
        xp = jnp.pad(xp, ((0, 0), (0, pad_rows), (0, 0), (0, 0)))
    xb = jnp.stack([xp[:, i * tr: i * tr + tr + 2] for i in range(n_tiles)],
                   axis=1)                         # (B, n_tiles, TR+2, W+2, C)

    kernel = functools.partial(
        _head_kernel, tr=tr, h=h, w=w, c_in=c_in,
        inv_hw=1.0 / hw, min_scale=float(min_scale))
    full3 = lambda i, q: (0, 0, 0)
    full2 = lambda i, q: (0, 0)

    out = pl.pallas_call(
        kernel,
        out_shape=jax.ShapeDtypeStruct((b, 1, 1), x_nchw.dtype),
        grid_spec=pltpu.PrefetchScalarGridSpec(
            num_scalar_prefetch=0,
            grid=(b, n_tiles),
            in_specs=[
                # If DMA latency is still exposed on v6e, sweep
                # pipeline_mode=pl.Buffered(3) on this spec.
                pl.BlockSpec((None, None, tr + 2, w + 2, c_in),
                             lambda i, q: (i, q, 0, 0, 0)),        # x blocks
                pl.BlockSpec((9, c_in, C_MID), full3),             # W1 (bf16)
                pl.BlockSpec((1, C_MID), full2),                   # b1 (f32)
                pl.BlockSpec((C_MID, s), full2),                   # W2 (f32)
                pl.BlockSpec((1, s), full2),                       # b2 (f32)
            ],
            out_specs=pl.BlockSpec((None, 1, 1), lambda i, q: (i, 0, 0)),
            scratch_shapes=[pltpu.VMEM((8, C_MID), F32)],
        ),
        compiler_params=pltpu.CompilerParams(
            dimension_semantics=("parallel", "arbitrary"),
            vmem_limit_bytes=48 * 1024 * 1024),
    )(xb,
      params["w1_mat"],
      params["b1"],
      params["w2_mat"],
      params["b2"])
    return out.reshape(b)


# --------------------------------------------------------------------------
# Parameters (deterministic, synthetic).  Torch layouts kept for the
# reference; matmul layouts derived for the kernel.
# --------------------------------------------------------------------------
def init_params(key, in_channels, max_scale=10):
    s = max_scale + 1
    k1, k2, k3, k4 = jax.random.split(key, 4)
    conv1_w = 0.1 * jax.random.normal(k1, (C_MID, in_channels, 3, 3), F32)  # OIHW
    conv1_b = 0.1 * jax.random.normal(k2, (C_MID,), F32)
    conv2_w = 0.1 * jax.random.normal(k3, (s, C_MID), F32)                  # (S, 128)
    conv2_b = 0.1 * jax.random.normal(k4, (s,), F32)
    # Kernel layouts: w1_mat[dy*3+dx, ci, co] = conv1_w[co, ci, dy, dx]  (bf16)
    w1_mat = jnp.transpose(conv1_w, (2, 3, 1, 0)).reshape(9, in_channels, C_MID)
    return dict(
        conv1_w=conv1_w, conv1_b=conv1_b, conv2_w=conv2_w, conv2_b=conv2_b,
        w1_mat=w1_mat.astype(jnp.bfloat16),
        b1=conv1_b.reshape(1, C_MID),
        w2_mat=jnp.transpose(conv2_w, (1, 0)),     # (128, S) f32
        b2=conv2_b.reshape(1, s))


class ProbScaleRegressionHeadPallas:
    def __init__(self, in_channels, key, max_scale=10, min_scale=0.01):
        self.max_scale = max_scale
        self.min_scale = min_scale
        self.params = init_params(key, in_channels, max_scale)

    def __call__(self, x_nchw, row_tile=None):
        return prob_scale_head_pallas(x_nchw, self.params,
                                      max_scale=self.max_scale,
                                      min_scale=self.min_scale,
                                      row_tile=row_tile)


# --------------------------------------------------------------------------
# Pure-JAX reference mirroring the PyTorch forward exactly (f32, conv_scale
# applied BEFORE the pooling), for validation.
# --------------------------------------------------------------------------
def head_ref(x, p, max_scale=10, min_scale=0.01):
    hi = jax.lax.Precision.HIGHEST
    y = jax.lax.conv_general_dilated(
        x, p["conv1_w"], window_strides=(1, 1), padding=((1, 1), (1, 1)),
        dimension_numbers=("NCHW", "OIHW", "NCHW"), precision=hi)
    y = jnp.maximum(y + p["conv1_b"][None, :, None, None], 0.0)
    logits_map = jnp.einsum("bchw,sc->bshw", y, p["conv2_w"], precision=hi)
    logits_map = logits_map + p["conv2_b"][None, :, None, None]
    logits = jnp.mean(logits_map, axis=(2, 3))            # adaptive_avg_pool2d(1)
    probs = jax.nn.softmax(logits, axis=1)
    scales = jnp.arange(0, max_scale + 1, dtype=x.dtype)
    expected = jnp.sum(scales[None, :] * probs, axis=1)
    return jnp.maximum(expected, min_scale)


if __name__ == "__main__":
    key = jax.random.PRNGKey(0)
    k_x, k_p, k_x2 = jax.random.split(key, 3)

    B, C_IN, H, W = 2, 4, 16, 16
    MAX_SCALE, MIN_SCALE = 10, 0.01

    head = ProbScaleRegressionHeadPallas(C_IN, k_p, MAX_SCALE, MIN_SCALE)

    # Test 1: the basic small shape (single spatial tile).
    x = jax.random.normal(k_x, (B, C_IN, H, W), F32)
    out = head(x)
    jax.block_until_ready(out)
    ref = head_ref(x, head.params, MAX_SCALE, MIN_SCALE)
    assert out.shape == (B,) and out.dtype == x.dtype
    err = float(jnp.max(jnp.abs(out - ref)))
    assert err < 2e-2, f"mismatch (test 1): max abs err = {err}"

    # Test 2: odd spatial size with a forced small row tile, exercising the
    # cdiv grid, multi-tile accumulation and the masked tail tile.
    x2 = jax.random.normal(k_x2, (3, C_IN, 13, 10), F32)
    out2 = head(x2, row_tile=8)
    jax.block_until_ready(out2)
    ref2 = head_ref(x2, head.params, MAX_SCALE, MIN_SCALE)
    err2 = float(jnp.max(jnp.abs(out2 - ref2)))
    assert out2.shape == (3,)
    assert err2 < 2e-2, f"mismatch (test 2): max abs err = {err2}"

    print("KERNEL_OK")
</pallas_src>

<mosaic_0001>
module attributes {stable_mosaic.version = 11 : i64} {
  func.func @_head_kernel(%arg0: i32, %arg1: i32, %arg2: memref<1x1x18x18x4xbf16, #tpu.memory_space<vmem>>, %arg3: memref<9x4x128xbf16, #tpu.memory_space<vmem>>, %arg4: memref<1x128xf32, #tpu.memory_space<vmem>>, %arg5: memref<128x11xf32, #tpu.memory_space<vmem>>, %arg6: memref<1x11xf32, #tpu.memory_space<vmem>>, %arg7: memref<1x1x1xf32, #tpu.memory_space<vmem>>, %arg8: memref<8x128xf32, #tpu.memory_space<vmem>>) attributes {dimension_semantics = [#tpu.dimension_semantics<parallel>, #tpu.dimension_semantics<arbitrary>], iteration_bounds = array<i64: 2, 1>, scalar_prefetch = 0 : i64, scratch_operands = 1 : i64, tpu.core_type = #tpu.core_type<tc>, window_params = [{transform_indices = @transform_0, window_bounds = array<i64: 1, 1, 18, 18, 4>}, {pipeline_mode = #tpu.pipeline_mode<synchronous>, transform_indices = @transform_1, window_bounds = array<i64: 9, 4, 128>}, {pipeline_mode = #tpu.pipeline_mode<synchronous>, transform_indices = @transform_2, window_bounds = array<i64: 1, 128>}, {pipeline_mode = #tpu.pipeline_mode<synchronous>, transform_indices = @transform_3, window_bounds = array<i64: 128, 11>}, {pipeline_mode = #tpu.pipeline_mode<synchronous>, transform_indices = @transform_4, window_bounds = array<i64: 1, 11>}, {transform_indices = @transform_5, window_bounds = array<i64: 1, 1, 1>}]} {
    %c0_i32 = arith.constant 0 : i32
    %0 = arith.cmpi eq, %arg1, %c0_i32 : i32
    %1 = arith.extui %0 : i1 to i32
    %c0_i32_0 = arith.constant 0 : i32
    %2 = arith.cmpi ne, %1, %c0_i32_0 : i32
    scf.if %2 {
      %cst_47 = arith.constant 0.000000e+00 : f32
      %84 = vector.broadcast %cst_47 : f32 to vector<8x128xf32>
      %c0_48 = arith.constant 0 : index
      %c0_49 = arith.constant 0 : index
      %85 = vector.load %arg8[%c0_48, %c0_49] : memref<8x128xf32, #tpu.memory_space<vmem>>, vector<8x128xf32>
      tpu.vector_store %arg8[%c0_48, %c0_49], %84 {strides = array<i32>} : memref<8x128xf32, #tpu.memory_space<vmem>>, vector<8x128xf32>,
    } else {
    }
    %c0 = arith.constant 0 : index
    %c0_1 = arith.constant 0 : index
    %c0_2 = arith.constant 0 : index
    %c0_3 = arith.constant 0 : index
    %c0_4 = arith.constant 0 : index
    %3 = vector.load %arg2[%c0, %c0_1, %c0_2, %c0_3, %c0_4] : memref<1x1x18x18x4xbf16, #tpu.memory_space<vmem>>, vector<1x1x18x18x4xbf16>
    %4 = vector.shape_cast %3 : vector<1x1x18x18x4xbf16> to vector<18x18x4xbf16>
    %cst = arith.constant 0.000000e+00 : f32
    %5 = vector.broadcast %cst : f32 to vector<256x128xf32>
    %6 = vector.extract_strided_slice %4 {offsets = [0, 0, 0], sizes = [16, 16, 4], strides = [1, 1, 1]} : vector<18x18x4xbf16> to vector<16x16x4xbf16>
    %7 = vector.shape_cast %6 : vector<16x16x4xbf16> to vector<256x4xbf16>
    %c0_5 = arith.constant 0 : index
    %c0_6 = arith.constant 0 : index
    %c0_7 = arith.constant 0 : index
    %8 = vector.load %arg3[%c0_5, %c0_6, %c0_7] : memref<9x4x128xbf16, #tpu.memory_space<vmem>>, vector<1x4x128xbf16>
    %9 = vector.shape_cast %8 : vector<1x4x128xbf16> to vector<4x128xbf16>
    %cst_8 = arith.constant dense<0.000000e+00> : vector<256x128xf32>
    %10 = tpu.matmul %7, %9, %cst_8 {dimension_numbers = #tpu.dot_dimension_numbers<[1], [0], [0], [1], [0, 0, 1, 1], [], []>} : vector<256x4xbf16>, vector<4x128xbf16>, vector<256x128xf32> -> vector<256x128xf32>
    %11 = arith.addf %5, %10 : vector<256x128xf32>
    %12 = vector.extract_strided_slice %4 {offsets = [0, 1, 0], sizes = [16, 16, 4], strides = [1, 1, 1]} : vector<18x18x4xbf16> to vector<16x16x4xbf16>
    %13 = vector.shape_cast %12 : vector<16x16x4xbf16> to vector<256x4xbf16>
    %c1 = arith.constant 1 : index
    %c0_9 = arith.constant 0 : index
    %c0_10 = arith.constant 0 : index
    %14 = vector.load %arg3[%c1, %c0_9, %c0_10] : memref<9x4x128xbf16, #tpu.memory_space<vmem>>, vector<1x4x128xbf16>
    %15 = vector.shape_cast %14 : vector<1x4x128xbf16> to vector<4x128xbf16>
    %cst_11 = arith.constant dense<0.000000e+00> : vector<256x128xf32>
    %16 = tpu.matmul %13, %15, %cst_11 {dimension_numbers = #tpu.dot_dimension_numbers<[1], [0], [0], [1], [0, 0, 1, 1], [], []>} : vector<256x4xbf16>, vector<4x128xbf16>, vector<256x128xf32> -> vector<256x128xf32>
    %17 = arith.addf %11, %16 : vector<256x128xf32>
    %18 = vector.extract_strided_slice %4 {offsets = [0, 2, 0], sizes = [16, 16, 4], strides = [1, 1, 1]} : vector<18x18x4xbf16> to vector<16x16x4xbf16>
    %19 = vector.shape_cast %18 : vector<16x16x4xbf16> to vector<256x4xbf16>
    %c2 = arith.constant 2 : index
    %c0_12 = arith.constant 0 : index
    %c0_13 = arith.constant 0 : index
    %20 = vector.load %arg3[%c2, %c0_12, %c0_13] : memref<9x4x128xbf16, #tpu.memory_space<vmem>>, vector<1x4x128xbf16>
    %21 = vector.shape_cast %20 : vector<1x4x128xbf16> to vector<4x128xbf16>
    %cst_14 = arith.constant dense<0.000000e+00> : vector<256x128xf32>
    %22 = tpu.matmul %19, %21, %cst_14 {dimension_numbers = #tpu.dot_dimension_numbers<[1], [0], [0], [1], [0, 0, 1, 1], [], []>} : vector<256x4xbf16>, vector<4x128xbf16>, vector<256x128xf32> -> vector<256x128xf32>
    %23 = arith.addf %17, %22 : vector<256x128xf32>
    %24 = vector.extract_strided_slice %4 {offsets = [1, 0, 0], sizes = [16, 16, 4], strides = [1, 1, 1]} : vector<18x18x4xbf16> to vector<16x16x4xbf16>
    %25 = vector.shape_cast %24 : vector<16x16x4xbf16> to vector<256x4xbf16>
    %c3 = arith.constant 3 : index
    %c0_15 = arith.constant 0 : index
    %c0_16 = arith.constant 0 : index
    %26 = vector.load %arg3[%c3, %c0_15, %c0_16] : memref<9x4x128xbf16, #tpu.memory_space<vmem>>, vector<1x4x128xbf16>
    %27 = vector.shape_cast %26 : vector<1x4x128xbf16> to vector<4x128xbf16>
    %cst_17 = arith.constant dense<0.000000e+00> : vector<256x128xf32>
    %28 = tpu.matmul %25, %27, %cst_17 {dimension_numbers = #tpu.dot_dimension_numbers<[1], [0], [0], [1], [0, 0, 1, 1], [], []>} : vector<256x4xbf16>, vector<4x128xbf16>, vector<256x128xf32> -> vector<256x128xf32>
    %29 = arith.addf %23, %28 : vector<256x128xf32>
    %30 = vector.extract_strided_slice %4 {offsets = [1, 1, 0], sizes = [16, 16, 4], strides = [1, 1, 1]} : vector<18x18x4xbf16> to vector<16x16x4xbf16>
    %31 = vector.shape_cast %30 : vector<16x16x4xbf16> to vector<256x4xbf16>
    %c4 = arith.constant 4 : index
    %c0_18 = arith.constant 0 : index
    %c0_19 = arith.constant 0 : index
    %32 = vector.load %arg3[%c4, %c0_18, %c0_19] : memref<9x4x128xbf16, #tpu.memory_space<vmem>>, vector<1x4x128xbf16>
    %33 = vector.shape_cast %32 : vector<1x4x128xbf16> to vector<4x128xbf16>
    %cst_20 = arith.constant dense<0.000000e+00> : vector<256x128xf32>
    %34 = tpu.matmul %31, %33, %cst_20 {dimension_numbers = #tpu.dot_dimension_numbers<[1], [0], [0], [1], [0, 0, 1, 1], [], []>} : vector<256x4xbf16>, vector<4x128xbf16>, vector<256x128xf32> -> vector<256x128xf32>
    %35 = arith.addf %29, %34 : vector<256x128xf32>
    %36 = vector.extract_strided_slice %4 {offsets = [1, 2, 0], sizes = [16, 16, 4], strides = [1, 1, 1]} : vector<18x18x4xbf16> to vector<16x16x4xbf16>
    %37 = vector.shape_cast %36 : vector<16x16x4xbf16> to vector<256x4xbf16>
    %c5 = arith.constant 5 : index
    %c0_21 = arith.constant 0 : index
    %c0_22 = arith.constant 0 : index
    %38 = vector.load %arg3[%c5, %c0_21, %c0_22] : memref<9x4x128xbf16, #tpu.memory_space<vmem>>, vector<1x4x128xbf16>
    %39 = vector.shape_cast %38 : vector<1x4x128xbf16> to vector<4x128xbf16>
    %cst_23 = arith.constant dense<0.000000e+00> : vector<256x128xf32>
    %40 = tpu.matmul %37, %39, %cst_23 {dimension_numbers = #tpu.dot_dimension_numbers<[1], [0], [0], [1], [0, 0, 1, 1], [], []>} : vector<256x4xbf16>, vector<4x128xbf16>, vector<256x128xf32> -> vector<256x128xf32>
    %41 = arith.addf %35, %40 : vector<256x128xf32>
    %42 = vector.extract_strided_slice %4 {offsets = [2, 0, 0], sizes = [16, 16, 4], strides = [1, 1, 1]} : vector<18x18x4xbf16> to vector<16x16x4xbf16>
    %43 = vector.shape_cast %42 : vector<16x16x4xbf16> to vector<256x4xbf16>
    %c6 = arith.constant 6 : index
    %c0_24 = arith.constant 0 : index
    %c0_25 = arith.constant 0 : index
    %44 = vector.load %arg3[%c6, %c0_24, %c0_25] : memref<9x4x128xbf16, #tpu.memory_space<vmem>>, vector<1x4x128xbf16>
    %45 = vector.shape_cast %44 : vector<1x4x128xbf16> to vector<4x128xbf16>
    %cst_26 = arith.constant dense<0.000000e+00> : vector<256x128xf32>
    %46 = tpu.matmul %43, %45, %cst_26 {dimension_numbers = #tpu.dot_dimension_numbers<[1], [0], [0], [1], [0, 0, 1, 1], [], []>} : vector<256x4xbf16>, vector<4x128xbf16>, vector<256x128xf32> -> vector<256x128xf32>
    %47 = arith.addf %41, %46 : vector<256x128xf32>
    %48 = vector.extract_strided_slice %4 {offsets = [2, 1, 0], sizes = [16, 16, 4], strides = [1, 1, 1]} : vector<18x18x4xbf16> to vector<16x16x4xbf16>
    %49 = vector.shape_cast %48 : vector<16x16x4xbf16> to vector<256x4xbf16>
    %c7 = arith.constant 7 : index
    %c0_27 = arith.constant 0 : index
    %c0_28 = arith.constant 0 : index
    %50 = vector.load %arg3[%c7, %c0_27, %c0_28] : memref<9x4x128xbf16, #tpu.memory_space<vmem>>, vector<1x4x128xbf16>
    %51 = vector.shape_cast %50 : vector<1x4x128xbf16> to vector<4x128xbf16>
    %cst_29 = arith.constant dense<0.000000e+00> : vector<256x128xf32>
    %52 = tpu.matmul %49, %51, %cst_29 {dimension_numbers = #tpu.dot_dimension_numbers<[1], [0], [0], [1], [0, 0, 1, 1], [], []>} : vector<256x4xbf16>, vector<4x128xbf16>, vector<256x128xf32> -> vector<256x128xf32>
    %53 = arith.addf %47, %52 : vector<256x128xf32>
    %54 = vector.extract_strided_slice %4 {offsets = [2, 2, 0], sizes = [16, 16, 4], strides = [1, 1, 1]} : vector<18x18x4xbf16> to vector<16x16x4xbf16>
    %55 = vector.shape_cast %54 : vector<16x16x4xbf16> to vector<256x4xbf16>
    %c8 = arith.constant 8 : index
    %c0_30 = arith.constant 0 : index
    %c0_31 = arith.constant 0 : index
    %56 = vector.load %arg3[%c8, %c0_30, %c0_31] : memref<9x4x128xbf16, #tpu.memory_space<vmem>>, vector<1x4x128xbf16>
    %57 = vector.shape_cast %56 : vector<1x4x128xbf16> to vector<4x128xbf16>
    %cst_32 = arith.constant dense<0.000000e+00> : vector<256x128xf32>
    %58 = tpu.matmul %55, %57, %cst_32 {dimension_numbers = #tpu.dot_dimension_numbers<[1], [0], [0], [1], [0, 0, 1, 1], [], []>} : vector<256x4xbf16>, vector<4x128xbf16>, vector<256x128xf32> -> vector<256x128xf32>
    %59 = arith.addf %53, %58 : vector<256x128xf32>
    %c0_33 = arith.constant 0 : index
    %c0_34 = arith.constant 0 : index
    %60 = vector.load %arg4[%c0_33, %c0_34] : memref<1x128xf32, #tpu.memory_space<vmem>>, vector<1x128xf32>
    %61 = vector.broadcast %60 : vector<1x128xf32> to vector<256x128xf32>
    %62 = arith.addf %59, %61 : vector<256x128xf32>
    %cst_35 = arith.constant 0.000000e+00 : f32
    %63 = vector.broadcast %cst_35 : f32 to vector<256x128xf32>
    %64 = arith.maximumf %62, %63 : vector<256x128xf32>
    %c16_i32 = arith.constant 16 : i32
    %65 = arith.muli %arg1, %c16_i32 : i32
    %c16_i32_36 = arith.constant 16 : i32
    %66 = arith.subi %c16_i32_36, %65 : i32
    %c16_i32_37 = arith.constant 16 : i32
    %67 = arith.minsi %c16_i32_37, %66 : i32
    %68 = tpu.iota {dimensions = array<i32: 0>} : vector<256x1xi32>
    %c16_i32_38 = arith.constant 16 : i32
    %69 = arith.muli %67, %c16_i32_38 : i32
    %70 = vector.broadcast %69 : i32 to vector<256x1xi32>
    %71 = arith.cmpi slt, %68, %70 : vector<256x1xi32>
    %cst_39 = arith.constant 0.000000e+00 : f32
    %72 = vector.shape_cast %71 : vector<256x1xi1> to vector<256x1xi1>
    %73 = vector.broadcast %72 : vector<256x1xi1> to vector<256x128xi1>
    %74 = vector.broadcast %cst_39 : f32 to vector<256x128xf32>
    %75 = arith.select %73, %64, %74 : vector<256x128xi1>, vector<256x128xf32>
    %c0_40 = arith.constant 0 : index
    %c0_41 = arith.constant 0 : index
    %76 = vector.load %arg8[%c0_40, %c0_41] : memref<8x128xf32, #tpu.memory_space<vmem>>, vector<8x128xf32>
    %77 = vector.shape_cast %75 : vector<256x128xf32> to vector<32x8x128xf32>
    %cst_42 = arith.constant dense<0.000000e+00> : vector<8x128xf32>
    %78 = vector.multi_reduction <add>, %77, %cst_42 [0] : vector<32x8x128xf32> to vector<8x128xf32>
    %79 = arith.addf %76, %78 : vector<8x128xf32>
    %c0_43 = arith.constant 0 : index
    %c0_44 = arith.constant 0 : index
    %80 = vector.load %arg8[%c0_43, %c0_44] : memref<8x128xf32, #tpu.memory_space<vmem>>, vector<8x128xf32>
    tpu.vector_store %arg8[%c0_43, %c0_44], %79 {strides = array<i32>} : memref<8x128xf32, #tpu.memory_space<vmem>>, vector<8x128xf32>,
    %c0_i32_45 = arith.constant 0 : i32
    %81 = arith.cmpi eq, %arg1, %c0_i32_45 : i32
    %82 = arith.extui %81 : i1 to i32
    %c0_i32_46 = arith.constant 0 : i32
    %83 = arith.cmpi ne, %82, %c0_i32_46 : i32
    scf.if %83 {
      %c0_47 = arith.constant 0 : index
      %c0_48 = arith.constant 0 : index
      %84 = vector.load %arg8[%c0_47, %c0_48] : memref<8x128xf32, #tpu.memory_space<vmem>>, vector<8x128xf32>
      %cst_49 = arith.constant dense<0.000000e+00> : vector<128xf32>
      %85 = vector.multi_reduction <add>, %84, %cst_49 [0] : vector<8x128xf32> to vector<128xf32>
      %86 = vector.shape_cast %85 : vector<128xf32> to vector<1x128xf32>
      %cst_50 = arith.constant 3.906250e-03 : f32
      %87 = vector.broadcast %cst_50 : f32 to vector<1x128xf32>
      %88 = arith.mulf %86, %87 : vector<1x128xf32>
      %c0_51 = arith.constant 0 : index
      %c0_52 = arith.constant 0 : index
      %89 = vector.load %arg5[%c0_51, %c0_52] : memref<128x11xf32, #tpu.memory_space<vmem>>, vector<128x11xf32>
      %cst_53 = arith.constant dense<0.000000e+00> : vector<1x11xf32>
      %90 = tpu.matmul %88, %89, %cst_53 {dimension_numbers = #tpu.dot_dimension_numbers<[1], [0], [0], [1], [0, 0, 1, 1], [], []>} : vector<1x128xf32>, vector<128x11xf32>, vector<1x11xf32> -> vector<1x11xf32>
      %c0_54 = arith.constant 0 : index
      %c0_55 = arith.constant 0 : index
      %91 = vector.load %arg6[%c0_54, %c0_55] : memref<1x11xf32, #tpu.memory_space<vmem>>, vector<1x11xf32>
      %92 = arith.addf %90, %91 : vector<1x11xf32>
      %cst_56 = arith.constant dense<0xFF800000> : vector<1xf32>
      %93 = vector.multi_reduction <maximumf>, %92, %cst_56 [1] : vector<1x11xf32> to vector<1xf32>
      %94 = vector.shape_cast %93 : vector<1xf32> to vector<1x1xf32>
      %95 = vector.broadcast %94 : vector<1x1xf32> to vector<1x11xf32>
      %96 = arith.subf %92, %95 : vector<1x11xf32>
      %97 = math.exp %96 : vector<1x11xf32>
      %cst_57 = arith.constant dense<0.000000e+00> : vector<1xf32>
      %98 = vector.multi_reduction <add>, %97, %cst_57 [1] : vector<1x11xf32> to vector<1xf32>
      %99 = vector.shape_cast %98 : vector<1xf32> to vector<1x1xf32>
      %100 = vector.broadcast %99 : vector<1x1xf32> to vector<1x11xf32>
      %101 = arith.divf %97, %100 : vector<1x11xf32>
      %102 = tpu.iota {dimensions = array<i32: 1>} : vector<1x11xi32>
      %103 = arith.sitofp %102 : vector<1x11xi32> to vector<1x11xf32>
      %104 = arith.mulf %101, %103 : vector<1x11xf32>
      %cst_58 = arith.constant dense<0.000000e+00> : vector<1xf32>
      %105 = vector.multi_reduction <add>, %104, %cst_58 [1] : vector<1x11xf32> to vector<1xf32>
      %106 = vector.shape_cast %105 : vector<1xf32> to vector<1x1xf32>
      %cst_59 = arith.constant 0.00999999977 : f32
      %107 = vector.broadcast %cst_59 : f32 to vector<1x1xf32>
      %108 = arith.maximumf %106, %107 : vector<1x1xf32>
      %c0_60 = arith.constant 0 : index
      %c0_61 = arith.constant 0 : index
      %c0_62 = arith.constant 0 : index
      %109 = vector.load %arg7[%c0_60, %c0_61, %c0_62] : memref<1x1x1xf32, #tpu.memory_space<vmem>>, vector<1x1x1xf32>
      %110 = vector.shape_cast %109 : vector<1x1x1xf32> to vector<1x1xf32>
      %111 = vector.shape_cast %108 : vector<1x1xf32> to vector<1x1x1xf32>
      tpu.vector_store %arg7[%c0_60, %c0_61, %c0_62], %111 {strides = array<i32>} : memref<1x1x1xf32, #tpu.memory_space<vmem>>, vector<1x1x1xf32>,
    } else {
    }
    return
  }
  func.func @transform_0(%arg0: i32, %arg1: i32) -> (i32, i32, i32, i32, i32) {
    %c0_i32 = arith.constant 0 : i32
    %c0_i32_0 = arith.constant 0 : i32
    %c0_i32_1 = arith.constant 0 : i32
    %c0_i32_2 = arith.constant 0 : i32
    return %arg0, %arg1, %c0_i32, %c0_i32_0, %c0_i32_1 : i32, i32, i32, i32, i32
  }
  func.func @transform_1(%arg0: i32, %arg1: i32) -> (i32, i32, i32) {
    %c0_i32 = arith.constant 0 : i32
    %c0_i32_0 = arith.constant 0 : i32
    %c0_i32_1 = arith.constant 0 : i32
    %c0_i32_2 = arith.constant 0 : i32
    return %c0_i32, %c0_i32_0, %c0_i32_1 : i32, i32, i32
  }
  func.func @transform_2(%arg0: i32, %arg1: i32) -> (i32, i32) {
    %c0_i32 = arith.constant 0 : i32
    %c0_i32_0 = arith.constant 0 : i32
    %c0_i32_1 = arith.constant 0 : i32
    return %c0_i32, %c0_i32_0 : i32, i32
  }
  func.func @transform_3(%arg0: i32, %arg1: i32) -> (i32, i32) {
    %c0_i32 = arith.constant 0 : i32
    %c0_i32_0 = arith.constant 0 : i32
    %c0_i32_1 = arith.constant 0 : i32
    return %c0_i32, %c0_i32_0 : i32, i32
  }
  func.func @transform_4(%arg0: i32, %arg1: i32) -> (i32, i32) {
    %c0_i32 = arith.constant 0 : i32
    %c0_i32_0 = arith.constant 0 : i32
    %c0_i32_1 = arith.constant 0 : i32
    return %c0_i32, %c0_i32_0 : i32, i32
  }
  func.func @transform_5(%arg0: i32, %arg1: i32) -> (i32, i32, i32) {
    %c0_i32 = arith.constant 0 : i32
    %c0_i32_0 = arith.constant 0 : i32
    %c0_i32_1 = arith.constant 0 : i32
    return %arg0, %c0_i32, %c0_i32_0 : i32, i32, i32
  }
}

</mosaic_0001>

<bundles_post_ra>
// kernel: tpu_custom_call.1
= control target key start
LH: loop header
LB: loop body
LE: loop exit
PB: predicated region body
PF: predicated region fallthrough
CT: control target
= control target key end

     0   :  { %s4285_s18 = smov 0   ;;  %s4287_s19 = smov 0   ;;  %s5791_s0 = inlined_call_operand.vmem [shape: bf16[2,1,18,18,4], index: 0, kind: input, shape index: {}]   ;;  %s5792_s1 = inlined_call_operand.vmem [shape: bf16[9,4,128], index: 1, kind: input, shape index: {}]   ;;  %s5793_s2 = inlined_call_operand.vmem [shape: f32[1,128], index: 2, kind: input, shape index: {}]   ;;  %s5794_s3 = inlined_call_operand.vmem [shape: f32[128,11], index: 3, kind: input, shape index: {}]   ;;  %s5795_s4 = inlined_call_operand.vmem [shape: f32[1,11], index: 4, kind: input, shape index: {}]   ;;  %s5796_s5 = inlined_call_operand.vmem [shape: f32[2,1,1], index: 5, kind: output, shape index: {}]  }
   0x1   :  { %s4289_s20 = smov 0  }
   0x2 LB: > { %s27_s21 = sadd.s32 1, %s4247_s19  ;;  %p3428_p0 = scmp.ge.s32.totalorder %s4251_s20, 1  ;;  %s4251_s20 = sphi %s4289_s20, %s15_s20   ;;  %s4247_s19 = sphi %s4287_s19, %s5944_s19   ;;  %s4243_s18 = sphi %s4285_s18, %s5943_s18  }
   0x3   : > { %p29_p1 = scmp.ge.s32.totalorder %s27_s21, 2  ;;  %p205_p2 = scmp.lt.s32.totalorder %s4251_s20, 3 }
   0x5   : > { %s5946_s21 = smov (%p29_p1, %s27_s21), 0  ;;  %p206_p3 = pnand %p3428_p0, %p205_p2 }
   0x7   : > { %209 = sbr.rel (%p206_p3) target bundleno = 1226 (0x4ca), region = 40 }
   0xc   : > { %v3430_v0 = vld [vmem:[%s5792_s1 + $0x2] sm:$0x3]  ;;  %vm794_vm0 = vcmask 1041408   ;;  %p235_p4 = scmp.lt.s32.totalorder %s4243_s18, 1  ;;  %v3511_v2 = vld [vmem:[%s5792_s1 + $0x4] sm:$0x3] }
   0xd   : > { %4170 = vmatprep.subr.msk.bf16.mxu0 %vm794_vm0, %v3430_v0  ;;  %4171 = vmatprep.subr.msk.bf16.mxu1 %vm794_vm0, %v3430_v0  ;;  %v796_v1 = vsel %vm794_vm0, %v3430_v0, 0  ;;  %v307_v3 = vld [vmem:[%s5792_s1] sm:$0x3]  ;;  %vm308_vm1 = vsmask.f32 3328  ;;  %v4326_v4 = vsel %vm794_vm0, %v3511_v2, 0 }
   0xe   : > { %3828 = vmatpush3.bf16.msra.mxu0 %v796_v1  ;;  %4169 = vmatpush3.bf16.msra.mxu1 %v796_v1  ;;  %s5948_s18 = smov (!%p235_p4, %s4243_s18), 1  ;;  %vm309_vm2 = vsmask.f32 7440  ;;  %vm745_vm3 = vcmask 31744   ;;  %v4352_v16 = vsel %vm794_vm0, %v307_v3, 0  ;;  %vm1267_vm5 = vcmask 1042432  }
   0xf   : > { %4173 = vmatprep.subr.msk.bf16.mxu0 %vm794_vm0, %v3511_v2  ;;  %4172 = vmatprep.subr.msk.bf16.mxu1 %vm794_vm0, %v307_v3  ;;  %s4180_s28 = smul.u32 216, %s5948_s18  ;;  %v4357_v21 = vld [vmem:[%s5792_s1 + $0x6] sm:$0x3]  ;;  %vm4372_vm4 = vmor %vm308_vm1, %vm309_vm2  ;;  %vm1268_vm6 = vcmask 1046532   ;;  %vm4254_vm8 = vmmov 0   ;;  %vm3338_vm9 = vcmask 81920   ;;  %s246_s15 = scalar_lea.vmem %s5796_s5, %s5948_s18 }
  0x10   : > { %v4378_v36 = vsel %vm794_vm0, %v4357_v21, 0  ;;  %vm4720_vm7 = vmor %vm1267_vm5, %vm1268_vm6  ;;  %vm3358_vm10 = vcmask 0  }
  0x11   : > { %s4323_s6 = scalar_lea.vmem %s5791_s0, %s4180_s28 }
  0x12   : > { %v4329_v5 = vld [vmem:[%s4323_s6] sm:$0xf]  ;;  %v4332_v6 = vld [vmem:[%s4323_s6 + $0x4] sm:$0xf]  ;;  %v4335_v7 = vld [vmem:[%s4323_s6 + $0x8] sm:$0x1] }
  0x13   : > { %v312_v8 = vshrl.u32 %v4329_v5, 16  ;;  %v315_v9 = vshll.u32 %v4329_v5, 16  ;;  %v321_v10 = vshll.u32 %v4332_v6, 16  ;;  %v325_v11 = vshrl.u32 %v4332_v6, 16  ;;  %v4342_v12 = vld [vmem:[%s4323_s6 + $0x78] sm:$0xf] }
  0x14   : > { %v331_v13 = vshll.u32 %v4335_v7, 16  ;;  %v4346_v14 = vld [vmem:[%s4323_s6 + $0x7c] sm:$0xf]  ;;  %v4349_v15 = vld [vmem:[%s4323_s6 + $0x80] sm:$0x1]  ;;  %v552_v23 = vshrl.u32 %v4342_v12, 16 }
  0x15   : > { %5838 = vst [vmem:[#allocation3_spill] sm:$0xff] %v4349_v15  ;;  %v314_v17 = vrot.slane %v312_v8, 4  ;;  %v317_v18 = vrot.slane %v315_v9, 5  ;;  %v323_v19 = vrot.slane %v321_v10, 5  ;;  %v327_v20 = vrot.slane %v325_v11, 4 }
  0x16   : > { %v333_v22 = vrot.slane %v331_v13, 5  ;;  %v555_v24 = vshll.u32 %v4342_v12, 16  ;;  %v561_v25 = vshll.u32 %v4346_v14, 16  ;;  %v565_v28 = vshrl.u32 %v4346_v14, 16  ;;  %v4365_v30 = vld [vmem:[%s4323_s6 + $0xc] sm:$0xf] }
  0x17   : > { %v318_v26 = vor.u32 %v317_v18, %v314_v17  ;;  %v328_v27 = vor.u32 %v327_v20, %v323_v19  ;;  %v571_v29 = vshll.u32 %v4349_v15, 16  ;;  %v4368_v31 = vld [vmem:[%s4323_s6 + $0x10] sm:$0xf]  ;;  %v554_v33 = vrot.slane %v552_v23, 4  ;;  %v4381_v42 = vld [vmem:[%s4323_s6 + $0x14] sm:$0x1] }
  0x18   : > { %v557_v34 = vrot.slane %v555_v24, 5  ;;  %v563_v35 = vrot.slane %v561_v25, 5  ;;  %v567_v39 = vrot.slane %v565_v28, 4  ;;  %v336_v43 = vshrl.u32 %v4365_v30, 16  ;;  %v4392_v54 = vld [vmem:[%s4323_s6 + $0x84] sm:$0xf] }
  0x19   : > { %v319_v37 = vrot.slane %v318_v26, 4  ;;  %v329_v38 = vrot.slane %v328_v27, 4  ;;  %v573_v40 = vrot.slane %v571_v29, 5  ;;  %v339_v44 = vshll.u32 %v4365_v30, 16  ;;  %5841 = vst [vmem:[#allocation4_spill] sm:$0xff] %v4392_v54 }
  0x1a   : > { %v558_v41 = vor.u32 %v557_v34, %v554_v33  ;;  %v345_v45 = vshll.u32 %v4368_v31, 16  ;;  %v568_v48 = vor.u32 %v567_v39, %v563_v35  ;;  %v349_v49 = vshrl.u32 %v4368_v31, 16  ;;  %v4396_v59 = vld [vmem:[%s4323_s6 + $0x88] sm:$0xf]  ;;  %v4403_v63 = vld [vmem:[%s4323_s6 + $0x8c] sm:$0x1] }
  0x1b   : > { %v324_v46 = vsel %vm4372_vm4, %v319_v37, %v323_v19  ;;  %v334_v47 = vsel %vm4372_vm4, %v329_v38, %v333_v22  ;;  %v338_v52 = vrot.slane %v336_v43, 4  ;;  %v341_v53 = vrot.slane %v339_v44, 5  ;;  %5842 = vst [vmem:[#allocation5_spill] sm:$0xff] %v4403_v63  ;;  %v4411_v9 = vld [vmem:[%s4323_s6 + $0x18] sm:$0xf] }
  0x1c   : > { %v3431_v50 = vcombine.low %v324_v46, %v334_v47  ;;  %v559_v51 = vrot.slane %v558_v41, 4  ;;  %v569_v55 = vrot.slane %v568_v48, 4  ;;  %v347_v56 = vrot.slane %v345_v45, 5  ;;  %v4420_v23 = vld [vmem:[%s4323_s6 + $0x1c] sm:$0xf] }
  0x1d   : > { %v351_v57 = vrot.slane %v349_v49, 4  ;;  %v355_v58 = vshll.u32 %v4381_v42, 16  ;;  %v342_v61 = vor.u32 %v341_v53, %v338_v52  ;;  %v576_v8 = vshrl.u32 %v4392_v54, 16  ;;  %v4427_v27 = vld [vmem:[%s4323_s6 + $0x20] sm:$0x1] }
  0x1e   : > { %3829 = vmatprep.mubr.msk.bf16.mxu0 %vm745_vm3, %v3431_v50  ;;  %v564_v60 = vsel %vm4372_vm4, %v559_v51, %v563_v35  ;;  %v574_v1 = vsel %vm4372_vm4, %v569_v55, %v573_v40  ;;  %v579_v13 = vshll.u32 %v4392_v54, 16  ;;  %v585_v17 = vshll.u32 %v4396_v59, 16  ;;  %v4434_v37 = vld [vmem:[%s4323_s6 + $0x90] sm:$0xf]  ;;  %v4442_v43 = vld [vmem:[%s5792_s1 + $0x8] sm:$0x3] }
  0x1f   : > { %v352_v2 = vor.u32 %v351_v57, %v347_v56  ;;  %v357_v3 = vrot.slane %v355_v58, 5  ;;  %v4413_v10 = vcombine.low %v564_v60, %v574_v1  ;;  %v343_v11 = vrot.slane %v342_v61, 4  ;;  %5844 = vst [vmem:[#allocation7_spill] sm:$0xff] %v4434_v37  ;;  %v4447_v48 = vld [vmem:[%s4323_s6 + $0x94] sm:$0xf] }
  0x20   : > { %v578_v19 = vrot.slane %v576_v8, 4  ;;  %v589_v20 = vshrl.u32 %v4396_v59, 16  ;;  %v595_v22 = vshll.u32 %v4403_v63, 16  ;;  %v581_v25 = vrot.slane %v579_v13, 5  ;;  %5846 = vst [vmem:[#allocation9_spill] sm:$0xff] %v4447_v48 }
  0x21   : > { %5843 = vst [vmem:[#allocation6_spill] sm:$0xff] %v4413_v10  ;;  %v353_v18 = vrot.slane %v352_v2, 4  ;;  %3849 = vmatprep.mubr.msk.bf16.mxu1 %vm745_vm3, %v4413_v10  ;;  %v348_v24 = vsel %vm4372_vm4, %v343_v11, %v347_v56  ;;  %v587_v26 = vrot.slane %v585_v17, 5  ;;  %v360_v28 = vshrl.u32 %v4411_v9, 16  ;;  %v4455_v58 = vld [vmem:[%s4323_s6 + $0x98] sm:$0x1] }
  0x22   : > { %v591_v33 = vrot.slane %v589_v20, 4  ;;  %v597_v34 = vrot.slane %v595_v22, 5  ;;  %v363_v35 = vshll.u32 %v4411_v9, 16  ;;  %v582_v39 = vor.u32 %v581_v25, %v578_v19  ;;  %5847 = vst [vmem:[#allocation10_spill] sm:$0xff] %v4455_v58  ;;  %v4469_v17 = vld [vmem:[%s4323_s6 + $0x28] sm:$0xf] }
  0x23   : > { %v358_v29 = vsel %vm4372_vm4, %v353_v18, %v357_v3  ;;  %v362_v40 = vrot.slane %v360_v28, 4  ;;  %v369_v41 = vshll.u32 %v4420_v23, 16  ;;  %v373_v46 = vshrl.u32 %v4420_v23, 16  ;;  %v4461_v3 = vld [vmem:[%s4323_s6 + $0x24] sm:$0xf] }
  0x24   : > { %v4436_v38 = vcombine.low %v348_v24, %v358_v29  ;;  %v592_v44 = vor.u32 %v591_v33, %v587_v26  ;;  %v365_v45 = vrot.slane %v363_v35, 5  ;;  %v379_v47 = vshll.u32 %v4427_v27, 16  ;;  %v4477_v28 = vld [vmem:[%s4323_s6 + $0x2c] sm:$0x1] }
  0x25   : > { %v583_v49 = vrot.slane %v582_v39, 4  ;;  %v371_v50 = vrot.slane %v369_v41, 5  ;;  %v600_v51 = vshrl.u32 %v4434_v37, 16  ;;  %v603_v52 = vshll.u32 %v4434_v37, 16 }
  0x26   : > { %5845 = vst [vmem:[#allocation8_spill] sm:$0xff] %v4436_v38  ;;  %3830 = vmatmul.mubr.msk.bf16.vlgmr.msra.gmra.mxu0 %vm745_vm3, %v4436_v38  ;;  %v593_v53 = vrot.slane %v592_v44, 4  ;;  %v366_v55 = vor.u32 %v365_v45, %v362_v40  ;;  %v375_v56 = vrot.slane %v373_v46, 4  ;;  %v381_v57 = vrot.slane %v379_v47, 5  ;;  %v4485_v40 = vld [vmem:[%s4323_s6 + $0x9c] sm:$0xf] }
  0x27   : > { %3896 = vmatpush3.bf16.msra.mxu0 %v4326_v4  ;;  %v588_v60 = vsel %vm4372_vm4, %v583_v49, %v587_v26  ;;  %v602_v61 = vrot.slane %v600_v51, 4  ;;  %v605_v1 = vrot.slane %v603_v52, 5  ;;  %v609_v2 = vshll.u32 %v4447_v48, 16  ;;  %5849 = vst [vmem:[#allocation12_spill] sm:$0xff] %v4485_v40  ;;  %v4491_v47 = vld [vmem:[%s4323_s6 + $0xa0] sm:$0xf] }
  0x28   : > { %4175 = vmatprep.subr.msk.bf16.mxu0 %vm794_vm0, %v4442_v43  ;;  %v598_v4 = vsel %vm4372_vm4, %v593_v53, %v597_v34  ;;  %v367_v8 = vrot.slane %v366_v55, 4  ;;  %v376_v11 = vor.u32 %v375_v56, %v371_v50  ;;  %v613_v13 = vshrl.u32 %v4447_v48, 16  ;;  %5850 = vst [vmem:[#allocation13_spill] sm:$0xff] %v4491_v47  ;;  %v4632_v38 = vld [vmem:[%s4323_s6 + $0x5c] sm:$0x1] }
  0x29   : > { %v4471_v18 = vcombine.low %v588_v60, %v598_v4  ;;  %v606_v19 = vor.u32 %v605_v1, %v602_v61  ;;  %v611_v20 = vrot.slane %v609_v2, 5  ;;  %v619_v22 = vshll.u32 %v4455_v58, 16 }
  0x2a   : > { %v372_v24 = vsel %vm4372_vm4, %v367_v8, %v371_v50  ;;  %v377_v25 = vrot.slane %v376_v11, 4  ;;  %v615_v26 = vrot.slane %v613_v13, 4  ;;  %v384_v29 = vshrl.u32 %v4461_v3, 16 }
  0x2b   : > { %5848 = vst [vmem:[#allocation11_spill] sm:$0xff] %v4471_v18  ;;  %3850 = vmatmul.mubr.msk.bf16.vlgmr.msra.gmra.mxu1 %vm745_vm3, %v4471_v18  ;;  %v607_v33 = vrot.slane %v606_v19, 4  ;;  %v621_v34 = vrot.slane %v619_v22, 5  ;;  %v387_v35 = vshll.u32 %v4461_v3, 16  ;;  %v393_v39 = vshll.u32 %v4469_v17, 16 }
  0x2c   : > { %v382_v41 = vsel %vm4372_vm4, %v377_v25, %v381_v57  ;;  %v616_v44 = vor.u32 %v615_v26, %v611_v20  ;;  %v386_v45 = vrot.slane %v384_v29, 4  ;;  %v397_v46 = vshrl.u32 %v4469_v17, 16  ;;  %3862 = vmatpush3.bf16.msra.mxu1 %v4352_v16  ;;  %v4502_v57 = vld [vmem:[%s4323_s6 + $0xa4] sm:$0x1]  ;;  %v4516_v19 = vld [vmem:[%s4323_s6 + $0x34] sm:$0xf] }
  0x2d   : > { %v4494_v49 = vcombine.low %v372_v24, %v382_v41  ;;  %v612_v50 = vsel %vm4372_vm4, %v607_v33, %v611_v20  ;;  %v389_v51 = vrot.slane %v387_v35, 5  ;;  %v395_v52 = vrot.slane %v393_v39, 5  ;;  %4174 = vmatprep.subr.msk.bf16.mxu1 %vm794_vm0, %v4357_v21  ;;  %5852 = vst [vmem:[#allocation15_spill] sm:$0xff] %v4502_v57  ;;  %v4511_v21 = vld [vmem:[%s4323_s6 + $0x30] sm:$0xf] }
  0x2e   : > { %v617_v53 = vrot.slane %v616_v44, 4  ;;  %v399_v55 = vrot.slane %v397_v46, 4  ;;  %v403_v56 = vshll.u32 %v4477_v28, 16  ;;  %v624_v16 = vshrl.u32 %v4485_v40, 16  ;;  %v4527_v41 = vld [vmem:[%s4323_s6 + $0x38] sm:$0x1] }
  0x2f   : > { %5851 = vst [vmem:[#allocation14_spill] sm:$0xff] %v4494_v49  ;;  %3833 = vmatprep.mubr.msk.bf16.mxu0 %vm745_vm3, %v4494_v49  ;;  %v390_v60 = vor.u32 %v389_v51, %v386_v45  ;;  %v627_v61 = vshll.u32 %v4485_v40, 16  ;;  %v633_v1 = vshll.u32 %v4491_v47, 16  ;;  %v637_v2 = vshrl.u32 %v4491_v47, 16  ;;  %v4532_v46 = vld [vmem:[%s4323_s6 + $0xa8] sm:$0xf] }
  0x30   : > { %v622_v4 = vsel %vm4372_vm4, %v617_v53, %v621_v34  ;;  %v400_v8 = vor.u32 %v399_v55, %v395_v52  ;;  %v405_v11 = vrot.slane %v403_v56, 5  ;;  %v626_v13 = vrot.slane %v624_v16, 4  ;;  %v4537_v56 = vld [vmem:[%s4323_s6 + $0xac] sm:$0xf]  ;;  %v4692_v47 = vld [vmem:[%s4323_s6 + $0x74] sm:$0x1] }
  0x31   : > { %v4518_v20 = vcombine.low %v612_v50, %v622_v4  ;;  %v391_v22 = vrot.slane %v390_v60, 4  ;;  %v629_v24 = vrot.slane %v627_v61, 5  ;;  %v635_v25 = vrot.slane %v633_v1, 5 }
  0x32   : > { %v401_v26 = vrot.slane %v400_v8, 4  ;;  %v639_v29 = vrot.slane %v637_v2, 4  ;;  %v643_v33 = vshll.u32 %v4502_v57, 16  ;;  %v408_v35 = vshrl.u32 %v4511_v21, 16 }
  0x33   : > { %5853 = vst [vmem:[#allocation16_spill] sm:$0xff] %v4518_v20  ;;  %3853 = vmatprep.mubr.msk.bf16.mxu1 %vm745_vm3, %v4518_v20  ;;  %v396_v34 = vsel %vm4372_vm4, %v391_v22, %v395_v52  ;;  %v630_v39 = vor.u32 %v629_v24, %v626_v13  ;;  %v411_v44 = vshll.u32 %v4511_v21, 16  ;;  %v417_v45 = vshll.u32 %v4516_v19, 16  ;;  %v4549_v22 = vld [vmem:[%s4323_s6 + $0xb0] sm:$0x1] }
  0x34   : > { %v406_v50 = vsel %vm4372_vm4, %v401_v26, %v405_v11  ;;  %v640_v51 = vor.u32 %v639_v29, %v635_v25  ;;  %v645_v53 = vrot.slane %v643_v33, 5  ;;  %v410_v55 = vrot.slane %v408_v35, 4  ;;  %v4554_v29 = vld [vmem:[%s4323_s6 + $0x3c] sm:$0xf]  ;;  %v4583_v20 = vld [vmem:[%s4323_s6 + $0xb8] sm:$0xf] }
  0x35   : > { %v4539_v52 = vcombine.low %v396_v34, %v406_v50  ;;  %v631_v16 = vrot.slane %v630_v39, 4  ;;  %v413_v60 = vrot.slane %v411_v44, 5  ;;  %v419_v61 = vrot.slane %v417_v45, 5  ;;  %v4559_v44 = vld [vmem:[%s4323_s6 + $0x40] sm:$0xf] }
  0x36   : > { %v641_v1 = vrot.slane %v640_v51, 4  ;;  %v421_v2 = vshrl.u32 %v4516_v19, 16  ;;  %v427_v4 = vshll.u32 %v4527_v41, 16  ;;  %v648_v8 = vshrl.u32 %v4532_v46, 16 }
  0x37   : > { %5854 = vst [vmem:[#allocation17_spill] sm:$0xff] %v4539_v52  ;;  %3834 = vmatmul.mubr.msk.bf16.gmra.mxu0 %vm745_vm3, %v4539_v52  ;;  %v636_v11 = vsel %vm4372_vm4, %v631_v16, %v635_v25  ;;  %v414_v13 = vor.u32 %v413_v60, %v410_v55  ;;  %v651_v24 = vshll.u32 %v4532_v46, 16  ;;  %v657_v26 = vshll.u32 %v4537_v56, 16 }
  0x38   : > { %v646_v33 = vsel %vm4372_vm4, %v641_v1, %v645_v53  ;;  %v423_v35 = vrot.slane %v421_v2, 4  ;;  %v429_v34 = vrot.slane %v427_v4, 5  ;;  %v650_v39 = vrot.slane %v648_v8, 4  ;;  %v4571_v2 = vld [vmem:[%s4323_s6 + $0x44] sm:$0x1] }
  0x39   : > { %v4561_v25 = vcombine.low %v636_v11, %v646_v33  ;;  %v415_v45 = vrot.slane %v414_v13, 4  ;;  %v653_v50 = vrot.slane %v651_v24, 5  ;;  %v659_v51 = vrot.slane %v657_v26, 5  ;;  %v4576_v11 = vld [vmem:[%s4323_s6 + $0xb4] sm:$0xf] }
  0x3a   : > { %v424_v55 = vor.u32 %v423_v35, %v419_v61  ;;  %v661_v16 = vshrl.u32 %v4537_v56, 16  ;;  %v667_v60 = vshll.u32 %v4549_v22, 16  ;;  %v432_v62 = vshrl.u32 %v4554_v29, 16 }
  0x3b   : > { %5855 = vst [vmem:[#allocation18_spill] sm:$0xff] %v4561_v25  ;;  %3854 = vmatmul.mubr.msk.bf16.gmra.mxu1 %vm745_vm3, %v4561_v25  ;;  %v420_v53 = vsel %vm4372_vm4, %v415_v45, %v419_v61  ;;  %v654_v1 = vor.u32 %v653_v50, %v650_v39  ;;  %v435_v4 = vshll.u32 %v4554_v29, 16  ;;  %v441_v8 = vshll.u32 %v4559_v44, 16 }
  0x3c   : > { %v425_v13 = vrot.slane %v424_v55, 4  ;;  %v663_v24 = vrot.slane %v661_v16, 4  ;;  %v669_v26 = vrot.slane %v667_v60, 5  ;;  %v434_v33 = vrot.slane %v432_v62, 4 }
  0x3d   : > { %v655_v35 = vrot.slane %v654_v1, 4  ;;  %v437_v0 = vrot.slane %v435_v4, 5  ;;  %v443_v25 = vrot.slane %v441_v8, 5  ;;  %v445_v61 = vshrl.u32 %v4559_v44, 16  ;;  %v4591_v4 = vld [vmem:[%s4323_s6 + $0xbc] sm:$0x1] }
  0x3e   : > { %v430_v39 = vsel %vm4372_vm4, %v425_v13, %v429_v34  ;;  %v664_v45 = vor.u32 %v663_v24, %v659_v51  ;;  %v451_v50 = vshll.u32 %v4571_v2, 16  ;;  %v672_v55 = vshrl.u32 %v4576_v11, 16  ;;  %v4594_v8 = vld [vmem:[%s4323_s6 + $0x48] sm:$0xf] }
  0x3f   : > { %v4586_v16 = vcombine.low %v420_v53, %v430_v39  ;;  %v660_v62 = vsel %vm4372_vm4, %v655_v35, %v659_v51  ;;  %v438_v60 = vor.u32 %v437_v0, %v434_v33  ;;  %v447_v1 = vrot.slane %v445_v61, 4 }
  0x40   : > { %v665_v34 = vrot.slane %v664_v45, 4  ;;  %v453_v13 = vrot.slane %v451_v50, 5  ;;  %v674_v24 = vrot.slane %v672_v55, 4  ;;  %v675_v18 = vshll.u32 %v4576_v11, 16  ;;  %v4605_v45 = vld [vmem:[%s4323_s6 + $0x4c] sm:$0xf] }
  0x41   : > { %5856 = vst [vmem:[#allocation19_spill] sm:$0xff] %v4586_v16  ;;  %3837 = vmatprep.mubr.msk.bf16.mxu0 %vm745_vm3, %v4586_v16  ;;  %v439_v53 = vrot.slane %v438_v60, 4  ;;  %v448_v39 = vor.u32 %v447_v1, %v443_v25  ;;  %v681_v51 = vshll.u32 %v4583_v20, 16  ;;  %v685_v0 = vshrl.u32 %v4583_v20, 16  ;;  %v4613_v16 = vld [vmem:[%s4323_s6 + $0x50] sm:$0x1] }
  0x42   : > { %v670_v33 = vsel %vm4372_vm4, %v665_v34, %v669_v26  ;;  %v677_v35 = vrot.slane %v675_v18, 5  ;;  %v691_v61 = vshll.u32 %v4591_v4, 16  ;;  %v456_v50 = vshrl.u32 %v4594_v8, 16  ;;  %v4616_v34 = vld [vmem:[%s4323_s6 + $0x54] sm:$0xf] }
  0x43   : > { %v4608_v55 = vcombine.low %v660_v62, %v670_v33  ;;  %v444_v60 = vsel %vm4372_vm4, %v439_v53, %v443_v25  ;;  %v449_v1 = vrot.slane %v448_v39, 4  ;;  %v683_v10 = vrot.slane %v681_v51, 5 }
  0x44   : > { %v678_v52 = vor.u32 %v677_v35, %v674_v24  ;;  %v687_v49 = vrot.slane %v685_v0, 4  ;;  %v693_v26 = vrot.slane %v691_v61, 5  ;;  %v458_v18 = vrot.slane %v456_v50, 4  ;;  %v4629_v35 = vld [vmem:[%s4323_s6 + $0x58] sm:$0xf] }
  0x45   : > { %5857 = vst [vmem:[#allocation20_spill] sm:$0xff] %v4608_v55  ;;  %3857 = vmatprep.mubr.msk.bf16.mxu1 %vm745_vm3, %v4608_v55  ;;  %v454_v62 = vsel %vm4372_vm4, %v449_v1, %v453_v13  ;;  %v459_v25 = vshll.u32 %v4594_v8, 16  ;;  %v465_v53 = vshll.u32 %v4605_v45, 16  ;;  %v469_v39 = vshrl.u32 %v4605_v45, 16 }
  0x46   : > { %v4625_v51 = vcombine.low %v444_v60, %v454_v62  ;;  %v679_v24 = vrot.slane %v678_v52, 4  ;;  %v688_v0 = vor.u32 %v687_v49, %v683_v10  ;;  %v475_v33 = vshll.u32 %v4613_v16, 16 }
  0x47   : > { %v461_v61 = vrot.slane %v459_v25, 5  ;;  %v467_v50 = vrot.slane %v465_v53, 5  ;;  %v471_v55 = vrot.slane %v469_v39, 4  ;;  %v480_v13 = vshrl.u32 %v4616_v34, 16 }
  0x48   : > { %5858 = vst [vmem:[#allocation21_spill] sm:$0xff] %v4625_v51  ;;  %3838 = vmatmul.mubr.msk.bf16.gmra.mxu0 %vm745_vm3, %v4625_v51  ;;  %v684_v60 = vsel %vm4372_vm4, %v679_v24, %v683_v10  ;;  %v689_v52 = vrot.slane %v688_v0, 4  ;;  %v477_v49 = vrot.slane %v475_v33, 5  ;;  %v483_v1 = vshll.u32 %v4616_v34, 16  ;;  %v4646_v10 = vld [vmem:[%s4323_s6 + $0x60] sm:$0xf] }
  0x49   : > { %v462_v62 = vor.u32 %v461_v61, %v458_v18  ;;  %v472_v25 = vor.u32 %v471_v55, %v467_v50  ;;  %v482_v53 = vrot.slane %v480_v13, 4  ;;  %v489_v39 = vshll.u32 %v4629_v35, 16  ;;  %v4651_v55 = vld [vmem:[%s4323_s6 + $0x64] sm:$0xf] }
  0x4a   : > { %v694_v57 = vsel %vm4372_vm4, %v689_v52, %v693_v26  ;;  %v485_v58 = vrot.slane %v483_v1, 5  ;;  %v493_v51 = vshrl.u32 %v4629_v35, 16  ;;  %v499_v63 = vshll.u32 %v4632_v38, 16  ;;  %v4658_v1 = vld [vmem:[%s4323_s6 + $0x68] sm:$0x1] }
  0x4b   : > { %v4648_v24 = vcombine.low %v684_v60, %v694_v57  ;;  %v463_v0 = vrot.slane %v462_v62, 4  ;;  %v473_v33 = vrot.slane %v472_v25, 4  ;;  %v491_v18 = vrot.slane %v489_v39, 5 }
  0x4c   : > { %v486_v61 = vor.u32 %v485_v58, %v482_v53  ;;  %v495_v26 = vrot.slane %v493_v51, 4  ;;  %v501_v13 = vrot.slane %v499_v63, 5  ;;  %v4655_v52 = vcombine.low %v4365_v30, %v4368_v31 }
  0x4d   : > { %5859 = vst [vmem:[#allocation22_spill] sm:$0xff] %v4648_v24  ;;  %3858 = vmatmul.mubr.msk.bf16.gmra.mxu1 %vm745_vm3, %v4648_v24  ;;  %v468_v57 = vsel %vm4372_vm4, %v463_v0, %v467_v50  ;;  %v478_v60 = vsel %vm4372_vm4, %v473_v33, %v477_v49  ;;  %v504_v58 = vshrl.u32 %v4646_v10, 16  ;;  %v507_v63 = vshll.u32 %v4646_v10, 16  ;;  %v4676_v50 = vld [vmem:[%s4323_s6 + $0x6c] sm:$0xf] }
  0x4e   : > { %v4668_v51 = vcombine.low %v468_v57, %v478_v60  ;;  %v5861_v62 = vcombine.low %v4329_v5, %v4332_v6  ;;  %v487_v25 = vrot.slane %v486_v61, 4  ;;  %v496_v53 = vor.u32 %v495_v26, %v491_v18  ;;  %v4681_v57 = vld [vmem:[%s4323_s6 + $0x70] sm:$0xf] }
  0x4f   : > { %v513_v39 = vshll.u32 %v4651_v55, 16  ;;  %v506_v0 = vrot.slane %v504_v58, 4  ;;  %v509_v49 = vrot.slane %v507_v63, 5  ;;  %v517_v33 = vshrl.u32 %v4651_v55, 16 }
  0x50   : > { %5860 = vst [vmem:[#allocation23_spill] sm:$0xff] %v4668_v51  ;;  %3863 = vmatprep.mubr.msk.bf16.mxu1 %vm745_vm3, %v5861_v62  ;;  %v523_v24 = vshll.u32 %v4658_v1, 16  ;;  %3841 = vmatprep.mubr.msk.bf16.mxu0 %vm745_vm3, %v4668_v51  ;;  %v492_v61 = vsel %vm4372_vm4, %v487_v25, %v491_v18  ;;  %v497_v26 = vrot.slane %v496_v53, 4  ;;  %v4689_v62 = vcombine.low %v4411_v9, %v4420_v23 }
  0x51   : > { %v515_v60 = vrot.slane %v513_v39, 5  ;;  %v510_v58 = vor.u32 %v509_v49, %v506_v0  ;;  %v519_v63 = vrot.slane %v517_v33, 4  ;;  %v528_v15 = vshrl.u32 %v4676_v50, 16 }
  0x52   : > { %v525_v40 = vrot.slane %v523_v24, 5  ;;  %v502_v37 = vsel %vm4372_vm4, %v497_v26, %v501_v13  ;;  %v531_v51 = vshll.u32 %v4676_v50, 16  ;;  %v537_v18 = vshll.u32 %v4681_v57, 16  ;;  %v4706_v13 = vld [vmem:[%s5792_s1 + $0xa] sm:$0x3] }
  0x53   : > { %v541_v25 = vshrl.u32 %v4681_v57, 16  ;;  %v4700_v53 = vcombine.low %v492_v61, %v502_v37  ;;  %v511_v39 = vrot.slane %v510_v58, 4  ;;  %v520_v48 = vor.u32 %v519_v63, %v515_v60 }
  0x54   : > { %v530_v0 = vrot.slane %v528_v15, 4  ;;  %v533_v49 = vrot.slane %v531_v51, 5  ;;  %v539_v24 = vrot.slane %v537_v18, 5  ;;  %v547_v54 = vshll.u32 %v4692_v47, 16 }
  0x55   : > { %v543_v33 = vrot.slane %v541_v25, 4  ;;  %v1282_v26 = vrot.slane %v4381_v42, 5  ;;  %3842 = vmatmul.mubr.msk.bf16.gmra.mxu0 %vm745_vm3, %v4700_v53  ;;  %3864 = vmatmul.mubr.msk.bf16.vlgmr.msra.gmra.mxu1 %vm745_vm3, %v4655_v52  ;;  %v516_v15 = vsel %vm4372_vm4, %v511_v39, %v515_v60  ;;  %v521_v37 = vrot.slane %v520_v48, 4 }
  0x56   : > { %3867 = vmatprep.mubr.msk.bf16.mxu1 %vm745_vm3, %v4689_v62  ;;  %v534_v51 = vor.u32 %v533_v49, %v530_v0  ;;  %v549_v58 = vrot.slane %v547_v54, 5  ;;  %3930 = vmatpush3.bf16.msra.mxu1 %v4378_v36  ;;  %v5862_v42 = vmov 0  ;;  %v3495_v63 = vrot.slane %v4329_v5, 9 }
  0x57   : > { %v544_v61 = vor.u32 %v543_v33, %v539_v24  ;;  %v5863_v42 = vsel %vm4720_vm7, 4294967295, %v5862_v42  ;;  %v1275_v18 = vrot.slane %v4335_v7, 5  ;;  %v526_v48 = vsel %vm4372_vm4, %v521_v37, %v525_v40  ;;  %4176 = vmatprep.subr.msk.bf16.mxu1 %vm794_vm0, %v4706_v13 }
  0x58   : > { %5864 = vst [vmem:[#allocation24_spill] sm:$0xff] %v5863_v42  ;;  %v1272_v60 = vrot.slane %v4332_v6, 5  ;;  %v3496_v25 = vrot.slane %v4365_v30, 9  ;;  %v4732_v36 = vcombine.low %v516_v15, %v526_v48  ;;  %v535_v54 = vrot.slane %v534_v51, 4 }
  0x59   : > { %v545_v39 = vrot.slane %v544_v61, 4  ;;  %v5865_v0 = vrot.slane %v4368_v31, 5  ;;  %v4738_v5 = vcombine.low %v4461_v3, %v4469_v17  ;;  %v4754_v37 = vcombine.low %v4511_v21, %v4516_v19 }
  0x5a   : > { %v1273_v7 = vsel %vm4720_vm7, %v3495_v63, %v1272_v60  ;;  %v1274_v6 = vrot.slane %v1272_v60, 4  ;;  %3845 = vmatprep.mubr.msk.bf16.mxu0 %vm745_vm3, %v4732_v36  ;;  %v540_v33 = vsel %vm4372_vm4, %v535_v54, %v539_v24  ;;  %v1286_v48 = vrot.slane %v4420_v23, 5 }
  0x5b   : > { %v1281_v49 = vrot.slane %v5865_v0, 4  ;;  %v5866_v30 = vmov %v5865_v0  ;;  %v550_v15 = vsel %vm4372_vm4, %v545_v39, %v549_v58  ;;  %v3497_v60 = vrot.slane %v4411_v9, 9 }
  0x5c   : > { %v1280_v40 = vsel %vm4720_vm7, %v3496_v25, %v5866_v30  ;;  %v4758_v31 = vcombine.low %v540_v33, %v550_v15  ;;  %v1276_v61 = vsel %vm4720_vm7, %v1274_v6, %v1275_v18  ;;  %v1289_v58 = vrot.slane %v4427_v27, 5 }
  0x5d   : > { %v1283_v51 = vsel %vm4720_vm7, %v1281_v49, %v1282_v26  ;;  %v3512_v24 = vcombine.low %v1273_v7, %v1276_v61  ;;  %3868 = vmatmul.mubr.msk.bf16.gmra.mxu1 %vm745_vm3, %v4738_v5  ;;  %v1288_v26 = vrot.slane %v1286_v48, 4  ;;  %v1293_v18 = vrot.slane %v4469_v17, 5 }
  0x5e   : > { %v4762_v63 = vcombine.low %v1280_v40, %v1283_v51  ;;  %3846 = vmatmul.mubr.msk.bf16.gmra.mxu0 %vm745_vm3, %v4758_v31  ;;  %3871 = vmatprep.mubr.msk.bf16.mxu1 %vm745_vm3, %v4754_v37  ;;  %v1300_v23 = vrot.slane %v4516_v19, 5  ;;  %v1287_v9 = vsel %vm4720_vm7, %v3497_v60, %v1286_v48  ;;  %v4782_v25 = vcombine.low %v4554_v29, %v4559_v44 }
  0x5f   : > { %3897 = vmatprep.mubr.msk.bf16.mxu0 %vm745_vm3, %v3512_v24  ;;  %v1290_v27 = vsel %vm4720_vm7, %v1288_v26, %v1289_v58  ;;  %v1915_v54 = vsel %vm794_vm0, %v4442_v43, 0  ;;  %v4788_v39 = vcombine.low %v4594_v8, %v4605_v45  ;;  %v3498_v17 = vrot.slane %v4461_v3, 9  ;;  %v4799_v43 = vld [vmem:[%s5792_s1 + $0xc] sm:$0x3] }
  0x60   : > { %v1295_v19 = vrot.slane %v1293_v18, 4  ;;  %v1296_v0 = vrot.slane %v4477_v28, 5  ;;  %v4792_v49 = vcombine.low %v1287_v9, %v1290_v27  ;;  %v3499_v7 = vrot.slane %v4511_v21, 9 }
  0x61   : > { %v1302_v6 = vrot.slane %v1300_v23, 4  ;;  %v1303_v30 = vrot.slane %v4527_v41, 5  ;;  %v1307_v3 = vrot.slane %v4559_v44, 5  ;;  %v1294_v28 = vsel %vm4720_vm7, %v3498_v17, %v1293_v18 }
  0x62   : > { %v1297_v21 = vsel %vm4720_vm7, %v1295_v19, %v1296_v0  ;;  %v1314_v41 = vrot.slane %v4605_v45, 5  ;;  %v1301_v40 = vsel %vm4720_vm7, %v3499_v7, %v1300_v23  ;;  %v4823_v33 = vcombine.low %v4616_v34, %v4629_v35 }
  0x63   : > { %v1304_v44 = vsel %vm4720_vm7, %v1302_v6, %v1303_v30  ;;  %v4827_v15 = vcombine.low %v4646_v10, %v4651_v55  ;;  %v3500_v45 = vrot.slane %v4554_v29, 9  ;;  %v4830_v51 = vcombine.low %v1294_v28, %v1297_v21 }
  0x64   : > { %v1309_v61 = vrot.slane %v1307_v3, 4  ;;  %v1310_v48 = vrot.slane %v4571_v2, 5  ;;  %v4835_v24 = vcombine.low %v4532_v46, %v4537_v56  ;;  %v4837_v60 = vcombine.low %v1301_v40, %v1304_v44 }
  0x65   : > { %3872 = vmatmul.mubr.msk.bf16.gmra.mxu1 %vm745_vm3, %v4782_v25  ;;  %v3501_v58 = vrot.slane %v4594_v8, 9  ;;  %v1316_v26 = vrot.slane %v1314_v41, 4  ;;  %v1317_v18 = vrot.slane %v4613_v16, 5  ;;  %v4843_v23 = vcombine.low %v4576_v11, %v4583_v20 }
  0x66   : > { %3898 = vmatmul.mubr.msk.bf16.vlgmr.msra.gmra.mxu0 %vm745_vm3, %v4762_v63  ;;  %3875 = vmatprep.mubr.msk.bf16.mxu1 %vm745_vm3, %v4788_v39  ;;  %v1308_v29 = vsel %vm4720_vm7, %v3500_v45, %v1307_v3  ;;  %v1311_v2 = vsel %vm4720_vm7, %v1309_v61, %v1310_v48  ;;  %v1321_v9 = vrot.slane %v4629_v35, 5  ;;  %v1328_v27 = vrot.slane %v4651_v55, 5 }
  0x67   : > { %3964 = vmatpush3.bf16.msra.mxu0 %v1915_v54  ;;  %3901 = vmatprep.mubr.msk.bf16.mxu0 %vm745_vm3, %v4792_v49  ;;  %v1315_v16 = vsel %vm4720_vm7, %v3501_v58, %v1314_v41  ;;  %v1318_v8 = vsel %vm4720_vm7, %v1316_v26, %v1317_v18  ;;  %v4865_v54 = vcombine.low %v4676_v50, %v4681_v57  ;;  %v3502_v0 = vrot.slane %v4616_v34, 9  ;;  %v5868_v18 = vld [vmem:[#allocation4_spill] sm:$0xff] }
  0x68   : > { %4177 = vmatprep.subr.msk.bf16.mxu0 %vm794_vm0, %v4799_v43  ;;  %v4867_v17 = vcombine.low %v1308_v29, %v1311_v2  ;;  %v4871_v19 = vcombine.low %v4342_v12, %v4346_v14  ;;  %v1324_v7 = vrot.slane %v4632_v38, 5  ;;  %v4875_v6 = vcombine.low %v1315_v16, %v1318_v8  ;;  %v5869_v2 = vld [vmem:[#allocation9_spill] sm:$0xff]  ;;  %v5870_v16 = vld [vmem:[#allocation7_spill] sm:$0xff] }
  0x69   : > { %v3503_v35 = vrot.slane %v4646_v10, 9  ;;  %v3509_v55 = vrot.slane %v4532_v46, 9  ;;  %v1370_v30 = vrot.slane %v4537_v56, 5  ;;  %v1323_v3 = vrot.slane %v1321_v9, 4 }
  0x6a   : > { %v1330_v28 = vrot.slane %v1328_v27, 4  ;;  %v1331_v21 = vrot.slane %v4658_v1, 5  ;;  %v1373_v41 = vrot.slane %v4549_v22, 5  ;;  %v3510_v38 = vrot.slane %v4576_v11, 9 }
  0x6b   : > { %v1371_v40 = vsel %vm4720_vm7, %v3509_v55, %v1370_v30  ;;  %v1372_v34 = vrot.slane %v1370_v30, 4  ;;  %v1377_v44 = vrot.slane %v4583_v20, 5  ;;  %v1380_v10 = vrot.slane %v4591_v4, 5 }
  0x6c   : > { %v1322_v20 = vsel %vm4720_vm7, %v3502_v0, %v1321_v9  ;;  %v1325_v11 = vsel %vm4720_vm7, %v1323_v3, %v1324_v7  ;;  %v1335_v4 = vrot.slane %v4681_v57, 5  ;;  %v1329_v45 = vsel %vm4720_vm7, %v3503_v35, %v1328_v27  ;;  %v5871_v7 = vld [vmem:[#allocation3_spill] sm:$0xff] }
  0x6d   : > { %3876 = vmatmul.mubr.msk.bf16.gmra.mxu1 %vm745_vm3, %v4823_v33  ;;  %v1374_v46 = vsel %vm4720_vm7, %v1372_v34, %v1373_v41  ;;  %v1378_v56 = vsel %vm4720_vm7, %v3510_v38, %v1377_v44  ;;  %v1379_v22 = vrot.slane %v1377_v44, 4  ;;  %v1332_v61 = vsel %vm4720_vm7, %v1330_v28, %v1331_v21  ;;  %v5872_v41 = vld [vmem:[#allocation13_spill] sm:$0xff] }
  0x6e   : > { %3902 = vmatmul.mubr.msk.bf16.gmra.mxu0 %vm745_vm3, %v4830_v51  ;;  %3879 = vmatprep.mubr.msk.bf16.mxu1 %vm745_vm3, %v4827_v15  ;;  %v4904_v1 = vcombine.low %v1371_v40, %v1374_v46  ;;  %v1342_v48 = vrot.slane %v4346_v14, 5  ;;  %v4917_v29 = vcombine.low %v5868_v18, %v4396_v59  ;;  %v4919_v57 = vcombine.low %v1322_v20, %v1325_v11  ;;  %v5873_v40 = vld [vmem:[#allocation12_spill] sm:$0xff]  ;;  %v5875_v11 = vld [vmem:[#allocation10_spill] sm:$0xff] }
  0x6f   : > { %3905 = vmatprep.mubr.msk.bf16.mxu0 %vm745_vm3, %v4837_v60  ;;  %v1381_v58 = vsel %vm4720_vm7, %v1379_v22, %v1380_v10  ;;  %v4923_v8 = vcombine.low %v5870_v16, %v5869_v2  ;;  %v4925_v9 = vcombine.low %v1329_v45, %v1332_v61  ;;  %v3504_v27 = vrot.slane %v4676_v50, 9 }
  0x70   : > { %v4913_v26 = vcombine.low %v1378_v56, %v1381_v58  ;;  %v1337_v14 = vrot.slane %v1335_v4, 4  ;;  %v1338_v0 = vrot.slane %v4692_v47, 5  ;;  %v1345_v35 = vrot.slane %v5871_v7, 5 }
  0x71   : > { %v3505_v55 = vrot.slane %v4342_v12, 9  ;;  %v1344_v30 = vrot.slane %v1342_v48, 4  ;;  %v1336_v47 = vsel %vm4720_vm7, %v3504_v27, %v1335_v4  ;;  %v1349_v12 = vrot.slane %v4396_v59, 5  ;;  %v5874_v59 = vld [vmem:[#allocation5_spill] sm:$0xff] }
  0x72   : > { %5867 = vst [vmem:[#allocation25_spill] sm:$0xff] %v4913_v26  ;;  %v1339_v50 = vsel %vm4720_vm7, %v1337_v14, %v1338_v0  ;;  %v1356_v21 = vrot.slane %v5869_v2, 5  ;;  %v4951_v34 = vcombine.low %v5873_v40, %v5872_v41  ;;  %v3506_v10 = vrot.slane %v5868_v18, 9  ;;  %v5876_v0 = vld [vmem:[#allocation15_spill] sm:$0xff] }
  0x73   : > { %v1343_v3 = vsel %vm4720_vm7, %v3505_v55, %v1342_v48  ;;  %v1346_v28 = vsel %vm4720_vm7, %v1344_v30, %v1345_v35  ;;  %v4953_v38 = vcombine.low %v1336_v47, %v1339_v50  ;;  %v1351_v46 = vrot.slane %v1349_v12, 4 }
  0x74   : > { %v4955_v44 = vcombine.low %v1343_v3, %v1346_v28  ;;  %v1352_v56 = vrot.slane %v5874_v59, 5  ;;  %v3507_v22 = vrot.slane %v5870_v16, 9  ;;  %v1358_v20 = vrot.slane %v1356_v21, 4  ;;  %v5878_v3 = vld [vmem:[#allocation14_spill] sm:$0xff]  ;;  %v5879_v28 = vld [vmem:[#allocation17_spill] sm:$0xff]  ;;  %v5884_v59 = vld [vmem:[#allocation11_spill] sm:$0xff] }
  0x75   : > { %3880 = vmatmul.mubr.msk.bf16.gmra.mxu1 %vm745_vm3, %v4865_v54  ;;  %v1359_v4 = vrot.slane %v5875_v11, 5  ;;  %v1350_v45 = vsel %vm4720_vm7, %v3506_v10, %v1349_v12  ;;  %v1363_v48 = vrot.slane %v5872_v41, 5  ;;  %v3508_v27 = vrot.slane %v5873_v40, 9  ;;  %v3636_v12 = vld [vmem:[%s5792_s1 + $0x10] sm:$0x3]  ;;  %v5882_v41 = vld [vmem:[#allocation23_spill] sm:$0xff] }
  0x76   : > { %3906 = vmatmul.mubr.msk.bf16.gmra.mxu0 %vm745_vm3, %v4867_v17  ;;  %3883 = vmatprep.mubr.msk.bf16.mxu1 %vm745_vm3, %v4871_v19  ;;  %v1353_v61 = vsel %vm4720_vm7, %v1351_v46, %v1352_v56  ;;  %v1357_v58 = vsel %vm4720_vm7, %v3507_v22, %v1356_v21  ;;  %v1366_v7 = vrot.slane %v5876_v0, 5  ;;  %v2127_v47 = vsel %vm794_vm0, %v4706_v13, 0  ;;  %v5877_v13 = vld [vmem:[#allocation8_spill] sm:$0xff]  ;;  %v5881_v21 = vld [vmem:[#allocation21_spill] sm:$0xff]  ;;  %v5883_v40 = vld [vmem:[#allocation6_spill] sm:$0xff] }
  0x77   : > { %3909 = vmatprep.mubr.msk.bf16.mxu0 %vm745_vm3, %v4875_v6  ;;  %v1360_v18 = vsel %vm4720_vm7, %v1358_v20, %v1359_v4  ;;  %v4978_v2 = vcombine.low %v1350_v45, %v1353_v61  ;;  %v1365_v14 = vrot.slane %v1363_v48, 4  ;;  %v1364_v35 = vsel %vm4720_vm7, %v3508_v27, %v1363_v48  ;;  %v5063_v10 = vld [vmem:[%s4323_s6 + $0xc0] sm:$0xf]  ;;  %v5066_v46 = vld [vmem:[%s4323_s6 + $0xc4] sm:$0xf]  ;;  %v5885_v27 = vld [vmem:[#allocation16_spill] sm:$0xff] }
  0x78   : > { %v4980_v16 = vcombine.low %v1357_v58, %v1360_v18  ;;  %v2333_v50 = vsel %vm794_vm0, %v4799_v43, 0  ;;  %v5880_v43 = vld [vmem:[#allocation19_spill] sm:$0xff]  ;;  %v1883_v56 = vshrl.u32 %v5063_v10, 16  ;;  %v1886_v22 = vshll.u32 %v5063_v10, 16  ;;  %v5081_v18 = vld [vmem:[%s4323_s6 + $0xc8] sm:$0x1] }
  0x79   : > { %v1367_v55 = vsel %vm4720_vm7, %v1365_v14, %v1366_v7  ;;  %v1896_v20 = vshrl.u32 %v5066_v46, 16  ;;  %v1892_v11 = vshll.u32 %v5066_v46, 16  ;;  %v5078_v4 = vcombine.low %v5063_v10, %v5066_v46  ;;  %v5886_v14 = vld [vmem:[#allocation18_spill] sm:$0xff] }
  0x7a   : > { %v4996_v30 = vcombine.low %v1364_v35, %v1367_v55  ;;  %v1885_v45 = vrot.slane %v1883_v56, 4  ;;  %v1888_v61 = vrot.slane %v1886_v22, 5  ;;  %v1902_v35 = vshll.u32 %v5081_v18, 16  ;;  %v5887_v56 = vld [vmem:[#allocation20_spill] sm:$0xff]  ;;  %v5888_v22 = vld [vmem:[#allocation22_spill] sm:$0xff] }
  0x7b   : > { %v1894_v48 = vrot.slane %v1892_v11, 5  ;;  %v1898_v58 = vrot.slane %v1896_v20, 4  ;;  %v2773_v11 = vsel %vm794_vm0, %v3636_v12, 0 }
  0x7c   : > { %v1889_v0 = vor.u32 %v1888_v61, %v1885_v45 }
  0x7d   : > { %3884 = vmatmul.mubr.msk.bf16.gmra.mxu1 %vm745_vm3, %v4917_v29  ;;  %v1899_v7 = vor.u32 %v1898_v58, %v1894_v48 }
  0x7e   : > { %3910 = vmatmul.mubr.msk.bf16.gmra.mxu0 %vm745_vm3, %v4919_v57  ;;  %3887 = vmatprep.mubr.msk.bf16.mxu1 %vm745_vm3, %v4923_v8  ;;  %v1890_v55 = vrot.slane %v1889_v0, 4 }
  0x7f   : > { %3913 = vmatprep.mubr.msk.bf16.mxu0 %vm745_vm3, %v4925_v9 }
  0x85   : > { %3888 = vmatmul.mubr.msk.bf16.gmra.mxu1 %vm745_vm3, %v4951_v34 }
  0x86   : > { %3914 = vmatmul.mubr.msk.bf16.gmra.mxu0 %vm745_vm3, %v4953_v38  ;;  %3891 = vmatprep.mubr.msk.bf16.mxu1 %vm745_vm3, %v4835_v24 }
  0x87   : > { %3917 = vmatprep.mubr.msk.bf16.mxu0 %vm745_vm3, %v4955_v44 }
  0x8d   : > { %3892 = vmatmul.mubr.msk.bf16.gmra.mxu1 %vm745_vm3, %v4843_v23 }
  0x8e   : > { %3918 = vmatmul.mubr.msk.bf16.gmra.mxu0 %vm745_vm3, %v4978_v2  ;;  %3931 = vmatprep.mubr.msk.bf16.mxu1 %vm745_vm3, %v4655_v52  ;;  %v3617_v52 = vld [vmem:[%s5792_s1 + $0xe] sm:$0x3] }
  0x8f   : > { %3921 = vmatprep.mubr.msk.bf16.mxu0 %vm745_vm3, %v4980_v16 }
  0x95   : > { %3932 = vmatmul.mubr.msk.bf16.vlgmr.msra.gmra.mxu1 %vm745_vm3, %v4689_v62 }
  0x96   : > { %3922 = vmatmul.mubr.msk.bf16.gmra.mxu0 %vm745_vm3, %v4996_v30  ;;  %3935 = vmatprep.mubr.msk.bf16.mxu1 %vm745_vm3, %v4738_v5 }
  0x97   : > { %3925 = vmatprep.mubr.msk.bf16.mxu0 %vm745_vm3, %v4904_v1  ;;  %3998 = vmatpush3.bf16.msra.mxu1 %v2127_v47  ;;  %v1900_v47 = vrot.slane %v1899_v7, 4 }
  0x98   : > { %4178 = vmatprep.subr.msk.bf16.mxu1 %vm794_vm0, %v3617_v52 }
  0x9d   : > { %3936 = vmatmul.mubr.msk.bf16.gmra.mxu1 %vm745_vm3, %v4754_v37 }
  0x9e   : > { %3926 = vmatmul.mubr.msk.bf16.gmra.mxu0 %vm745_vm3, %v4913_v26  ;;  %3939 = vmatprep.mubr.msk.bf16.mxu1 %vm745_vm3, %v4782_v25 }
  0x9f   : > { %3965 = vmatprep.mubr.msk.bf16.mxu0 %vm745_vm3, %v5877_v13  ;;  %v1904_v13 = vrot.slane %v1902_v35, 5  ;;  %v3580_v35 = vrot.slane %v5063_v10, 9 }
  0xa1   : > { %v1905_v20 = vsel %vm4372_vm4, %v1900_v47, %v1904_v13  ;;  %v2116_v47 = vrot.slane %v5081_v18, 5 }
  0xa5   : > { %3940 = vmatmul.mubr.msk.bf16.gmra.mxu1 %vm745_vm3, %v4788_v39 }
  0xa6   : > { %3966 = vmatmul.mubr.msk.bf16.vlgmr.msra.gmra.mxu0 %vm745_vm3, %v5878_v3  ;;  %3943 = vmatprep.mubr.msk.bf16.mxu1 %vm745_vm3, %v4823_v33 }
  0xa7   : > { %4032 = vmatpush3.bf16.msra.mxu0 %v2333_v50  ;;  %3969 = vmatprep.mubr.msk.bf16.mxu0 %vm745_vm3, %v5879_v28  ;;  %v2561_v50 = vsel %vm794_vm0, %v3617_v52, 0 }
  0xa8   : > { %4179 = vmatprep.subr.msk.bf16.mxu0 %vm794_vm0, %v3636_v12 }
  0xad   : > { %3944 = vmatmul.mubr.msk.bf16.gmra.mxu1 %vm745_vm3, %v4827_v15 }
  0xae   : > { %3970 = vmatmul.mubr.msk.bf16.gmra.mxu0 %vm745_vm3, %v5880_v43  ;;  %3947 = vmatprep.mubr.msk.bf16.mxu1 %vm745_vm3, %v4865_v54 }
  0xaf   : > { %3973 = vmatprep.mubr.msk.bf16.mxu0 %vm745_vm3, %v5881_v21 }
  0xb5   : > { %3948 = vmatmul.mubr.msk.bf16.gmra.mxu1 %vm745_vm3, %v4871_v19 }
  0xb6   : > { %3974 = vmatmul.mubr.msk.bf16.gmra.mxu0 %vm745_vm3, %v5882_v41  ;;  %3951 = vmatprep.mubr.msk.bf16.mxu1 %vm745_vm3, %v4917_v29 }
  0xb7   : > { %3977 = vmatprep.mubr.msk.bf16.mxu0 %vm745_vm3, %v4700_v53 }
  0xbd   : > { %3952 = vmatmul.mubr.msk.bf16.gmra.mxu1 %vm745_vm3, %v4923_v8 }
  0xbe   : > { %3978 = vmatmul.mubr.msk.bf16.gmra.mxu0 %vm745_vm3, %v4732_v36  ;;  %3955 = vmatprep.mubr.msk.bf16.mxu1 %vm745_vm3, %v4951_v34 }
  0xbf   : > { %3981 = vmatprep.mubr.msk.bf16.mxu0 %vm745_vm3, %v4758_v31 }
  0xc5   : > { %3956 = vmatmul.mubr.msk.bf16.gmra.mxu1 %vm745_vm3, %v4835_v24 }
  0xc6   : > { %3982 = vmatmul.mubr.msk.bf16.gmra.mxu0 %vm745_vm3, %v5883_v40  ;;  %3959 = vmatprep.mubr.msk.bf16.mxu1 %vm745_vm3, %v4843_v23 }
  0xc7   : > { %3985 = vmatprep.mubr.msk.bf16.mxu0 %vm745_vm3, %v5884_v59 }
  0xcd   : > { %3960 = vmatmul.mubr.msk.bf16.gmra.mxu1 %vm745_vm3, %v5078_v4 }
  0xce   : > { %3986 = vmatmul.mubr.msk.bf16.gmra.mxu0 %vm745_vm3, %v5885_v27  ;;  %3999 = vmatprep.mubr.msk.bf16.mxu1 %vm745_vm3, %v4762_v63  ;;  %v1895_v63 = vsel %vm4372_vm4, %v1890_v55, %v1894_v48 }
  0xcf   : > { %3989 = vmatprep.mubr.msk.bf16.mxu0 %vm745_vm3, %v5886_v14  ;;  %v5105_v52 = vcombine.low %v1895_v63, %v1905_v20 }
  0xd5   : > { %4000 = vmatmul.mubr.msk.bf16.vlgmr.msra.gmra.mxu1 %vm745_vm3, %v4792_v49 }
  0xd6   : > { %3990 = vmatmul.mubr.msk.bf16.gmra.mxu0 %vm745_vm3, %v5887_v56  ;;  %4003 = vmatprep.mubr.msk.bf16.mxu1 %vm745_vm3, %v4830_v51 }
  0xd7   : > { %3993 = vmatprep.mubr.msk.bf16.mxu0 %vm745_vm3, %v5888_v22  ;;  %4066 = vmatpush3.bf16.msra.mxu1 %v2561_v50 }
  0xdd   : > { %4004 = vmatmul.mubr.msk.bf16.gmra.mxu1 %vm745_vm3, %v4837_v60 }
  0xde   : > { %3994 = vmatmul.mubr.msk.bf16.gmra.mxu0 %vm745_vm3, %v5105_v52  ;;  %4007 = vmatprep.mubr.msk.bf16.mxu1 %vm745_vm3, %v4867_v17 }
  0xdf   : > { %4033 = vmatprep.mubr.msk.bf16.mxu0 %vm745_vm3, %v4689_v62 }
  0xe5   : > { %4008 = vmatmul.mubr.msk.bf16.gmra.mxu1 %vm745_vm3, %v4875_v6 }
  0xe6   : > { %4034 = vmatmul.mubr.msk.bf16.vlgmr.msra.gmra.mxu0 %vm745_vm3, %v4738_v5  ;;  %4011 = vmatprep.mubr.msk.bf16.mxu1 %vm745_vm3, %v4919_v57  ;;  %v3831_v45 = vpop.f32.mrf.mxu0 }
  0xe7   : > { %4100 = vmatpush3.bf16.msra.mxu0 %v2773_v11  ;;  %4037 = vmatprep.mubr.msk.bf16.mxu0 %vm745_vm3, %v4754_v37 }
  0xe8   : > { %v832_v61 = vpop.f32.mrf.mxu0 }
  0xea   : > { %v3832_v5 = vpop.f32.mrf.mxu0 }
  0xeb   : > { %v5128_v62 = vpop.f32.mrf.mxu1 }
  0xec   : > { %v835_v37 = vpop.f32.mrf.mxu0 }
  0xed   : > { %4012 = vmatmul.mubr.msk.bf16.gmra.mxu1 %vm745_vm3, %v4925_v9  ;;  %v5134_v12 = vpop.f32.mrf.mxu1 }
  0xee   : > { %4038 = vmatmul.mubr.msk.bf16.gmra.mxu0 %vm745_vm3, %v4782_v25  ;;  %4015 = vmatprep.mubr.msk.bf16.mxu1 %vm745_vm3, %v4953_v38 }
  0xef   : > { %4041 = vmatprep.mubr.msk.bf16.mxu0 %vm745_vm3, %v4788_v39  ;;  %v5140_v48 = vpop.f32.mrf.mxu1 }
  0xf1   : > { %v5146_v39 = vpop.f32.mrf.mxu1 }
  0xf5   : > { %4016 = vmatmul.mubr.msk.bf16.gmra.mxu1 %vm745_vm3, %v4955_v44 }
  0xf6   : > { %4042 = vmatmul.mubr.msk.bf16.gmra.mxu0 %vm745_vm3, %v4823_v33  ;;  %4019 = vmatprep.mubr.msk.bf16.mxu1 %vm745_vm3, %v4978_v2  ;;  %v2113_v33 = vrot.slane %v5066_v46, 5 }
  0xf7   : > { %4045 = vmatprep.mubr.msk.bf16.mxu0 %vm745_vm3, %v4827_v15  ;;  %v3835_v25 = vpop.f32.mrf.mxu0 }
  0xf8   : > { %v2115_v55 = vrot.slane %v2113_v33, 4 }
  0xf9   : > { %v848_v58 = vpop.f32.mrf.mxu0 }
  0xfa   : > { %v2117_v10 = vsel %vm4720_vm7, %v2115_v55, %v2116_v47 }
  0xfb   : > { %v5152_v0 = vpop.f32.mrf.mxu1  ;;  %v3836_v15 = vpop.f32.mrf.mxu0 }
  0xfc   : > { %5889 = vst [vmem:[#allocation4_spill] sm:$0xff] %v5152_v0 }
  0xfd   : > { %4020 = vmatmul.mubr.msk.bf16.gmra.mxu1 %vm745_vm3, %v4980_v16  ;;  %v5159_v7 = vpop.f32.mrf.mxu1  ;;  %v851_v13 = vpop.f32.mrf.mxu0 }
  0xfe   : > { %4046 = vmatmul.mubr.msk.bf16.gmra.mxu0 %vm745_vm3, %v4865_v54  ;;  %4023 = vmatprep.mubr.msk.bf16.mxu1 %vm745_vm3, %v4996_v30  ;;  %5890 = vst [vmem:[#allocation9_spill] sm:$0xff] %v5159_v7 }
  0xff   : > { %4049 = vmatprep.mubr.msk.bf16.mxu0 %vm745_vm3, %v4871_v19  ;;  %v5167_v54 = vpop.f32.mrf.mxu1  ;;  %v2114_v19 = vsel %vm4720_vm7, %v3580_v35, %v2113_v33 }
 0x100   : > { %5891 = vst [vmem:[#allocation7_spill] sm:$0xff] %v5167_v54  ;;  %v5179_v50 = vcombine.low %v2114_v19, %v2117_v10 }
 0x101   : > { %v5177_v18 = vpop.f32.mrf.mxu1 }
 0x102   : > { %5892 = vst [vmem:[#allocation3_spill] sm:$0xff] %v5179_v50 }
 0x105   : > { %4024 = vmatmul.mubr.msk.bf16.gmra.mxu1 %vm745_vm3, %v4904_v1 }
 0x106   : > { %4050 = vmatmul.mubr.msk.bf16.gmra.mxu0 %vm745_vm3, %v4917_v29  ;;  %4027 = vmatprep.mubr.msk.bf16.mxu1 %vm745_vm3, %v4913_v26 }
 0x107   : > { %4053 = vmatprep.mubr.msk.bf16.mxu0 %vm745_vm3, %v4923_v8 }
 0x108   : > { %v3839_v46 = vpop.f32.mrf.mxu0 }
 0x10a   : > { %v864_v29 = vpop.f32.mrf.mxu0 }
 0x10c   : > { %v3840_v8 = vpop.f32.mrf.mxu0 }
 0x10d   : > { %v5181_v63 = vpop.f32.mrf.mxu1  ;;  %4028 = vmatmul.mubr.msk.bf16.gmra.mxu1 %vm745_vm3, %v5179_v50 }
 0x10e   : > { %4054 = vmatmul.mubr.msk.bf16.gmra.mxu0 %vm745_vm3, %v4951_v34  ;;  %4067 = vmatprep.mubr.msk.bf16.mxu1 %vm745_vm3, %v5878_v3  ;;  %v867_v33 = vpop.f32.mrf.mxu0  ;;  %v5209_v3 = vld [vmem:[%s4323_s6 + $0xd0] sm:$0xf] }
 0x10f   : > { %4057 = vmatprep.mubr.msk.bf16.mxu0 %vm745_vm3, %v4835_v24  ;;  %v5191_v20 = vpop.f32.mrf.mxu1  ;;  %v5206_v24 = vld [vmem:[%s4323_s6 + $0xcc] sm:$0xf] }
 0x111   : > { %v5193_v11 = vpop.f32.mrf.mxu1 }
 0x113   : > { %v5195_v35 = vpop.f32.mrf.mxu1 }
 0x114   : > { %5893 = vst [vmem:[#allocation13_spill] sm:$0xff] %v5195_v35 }
 0x115   : > { %v3843_v55 = vpop.f32.mrf.mxu0  ;;  %v3865_v47 = vpop.f32.mrf.mxu1  ;;  %4068 = vmatmul.mubr.msk.bf16.vlgmr.msra.gmra.mxu1 %vm745_vm3, %v5879_v28 }
 0x116   : > { %4058 = vmatmul.mubr.msk.bf16.gmra.mxu0 %vm745_vm3, %v4843_v23  ;;  %v1133_v34 = vadd.f32 %v3865_v47, %v3831_v45  ;;  %4071 = vmatprep.mubr.msk.bf16.mxu1 %vm745_vm3, %v5880_v43  ;;  %v3600_v23 = vcombine.low %v5206_v24, %v5209_v3 }
 0x117   : > { %4061 = vmatprep.mubr.msk.bf16.mxu0 %vm745_vm3, %v5078_v4  ;;  %v880_v19 = vpop.f32.mrf.mxu0  ;;  %v1124_v10 = vpop.f32.mrf.mxu1 }
 0x118   : > { %v1125_v54 = vadd.f32 %v1124_v10, %v832_v61 }
 0x119   : > { %v3844_v50 = vpop.f32.mrf.mxu0  ;;  %v3866_v7 = vpop.f32.mrf.mxu1 }
 0x11a   : > { %v1136_v28 = vadd.f32 %v3866_v7, %v3832_v5 }
 0x11b   : > { %v883_v45 = vpop.f32.mrf.mxu0  ;;  %v1127_v47 = vpop.f32.mrf.mxu1 }
 0x11c   : > { %v1128_v42 = vadd.f32 %v1127_v47, %v835_v37 }
 0x11d   : > { %v3869_v26 = vpop.f32.mrf.mxu1  ;;  %4072 = vmatmul.mubr.msk.bf16.gmra.mxu1 %vm745_vm3, %v5881_v21 }
 0x11e   : > { %v5213_v4 = vpop.f32.mrf.mxu0  ;;  %4062 = vmatmul.mubr.msk.bf16.gmra.mxu0 %vm745_vm3, %v3600_v23  ;;  %v1149_v43 = vadd.f32 %v3869_v26, %v3835_v25  ;;  %4075 = vmatprep.mubr.msk.bf16.mxu1 %vm745_vm3, %v5882_v41 }
 0x11f   : > { %4101 = vmatprep.mubr.msk.bf16.mxu0 %vm745_vm3, %v4792_v49  ;;  %v1140_v5 = vpop.f32.mrf.mxu1 }
 0x120   : > { %v5222_v61 = vpop.f32.mrf.mxu0  ;;  %v1141_v7 = vadd.f32 %v1140_v5, %v848_v58 }
 0x121   : > { %v3870_v10 = vpop.f32.mrf.mxu1 }
 0x122   : > { %v5224_v37 = vpop.f32.mrf.mxu0  ;;  %v1152_v47 = vadd.f32 %v3870_v10, %v3836_v15 }
 0x123   : > { %v1143_v23 = vpop.f32.mrf.mxu1 }
 0x124   : > { %v5226_v35 = vpop.f32.mrf.mxu0  ;;  %v1144_v0 = vadd.f32 %v1143_v23, %v851_v13 }
 0x125   : > { %v3873_v21 = vpop.f32.mrf.mxu1  ;;  %4076 = vmatmul.mubr.msk.bf16.gmra.mxu1 %vm745_vm3, %v4700_v53 }
 0x126   : > { %v3899_v26 = vpop.f32.mrf.mxu0  ;;  %4102 = vmatmul.mubr.msk.bf16.vlgmr.msra.gmra.mxu0 %vm745_vm3, %v4830_v51  ;;  %v1165_v49 = vadd.f32 %v3873_v21, %v3839_v46  ;;  %4079 = vmatprep.mubr.msk.bf16.mxu1 %vm745_vm3, %v4732_v36 }
 0x127   : > { %v5232_v41 = vadd.f32 %v3899_v26, %v1133_v34  ;;  %4105 = vmatprep.mubr.msk.bf16.mxu0 %vm745_vm3, %v4837_v60  ;;  %v1156_v25 = vpop.f32.mrf.mxu1 }
 0x128   : > { %v1517_v58 = vpop.f32.mrf.mxu0  ;;  %v1157_v15 = vadd.f32 %v1156_v25, %v864_v29 }
 0x129   : > { %v5238_v13 = vadd.f32 %v1517_v58, %v1125_v54  ;;  %v3874_v5 = vpop.f32.mrf.mxu1 }
 0x12a   : > { %v3900_v10 = vpop.f32.mrf.mxu0  ;;  %v1168_v53 = vadd.f32 %v3874_v5, %v3840_v8 }
 0x12b   : > { %v5240_v23 = vadd.f32 %v3900_v10, %v1136_v28  ;;  %v1159_v51 = vpop.f32.mrf.mxu1  ;;  %v2532_v10 = vshll.u32 %v5206_v24, 16 }
 0x12c   : > { %v1520_v46 = vpop.f32.mrf.mxu0  ;;  %v1160_v34 = vadd.f32 %v1159_v51, %v867_v33 }
 0x12d   : > { %v5242_v21 = vadd.f32 %v1520_v46, %v1128_v42  ;;  %v3877_v26 = vpop.f32.mrf.mxu1  ;;  %4080 = vmatmul.mubr.msk.bf16.gmra.mxu1 %vm745_vm3, %v4758_v31 }
 0x12e   : > { %v3903_v36 = vpop.f32.mrf.mxu0  ;;  %4106 = vmatmul.mubr.msk.bf16.gmra.mxu0 %vm745_vm3, %v4867_v17  ;;  %v1181_v60 = vadd.f32 %v3877_v26, %v3843_v55  ;;  %4083 = vmatprep.mubr.msk.bf16.mxu1 %vm745_vm3, %v5883_v40  ;;  %v2529_v40 = vshrl.u32 %v5206_v24, 16 }
 0x12f   : > { %v5248_v54 = vadd.f32 %v3903_v36, %v1149_v43  ;;  %4109 = vmatprep.mubr.msk.bf16.mxu0 %vm745_vm3, %v4875_v6  ;;  %v1172_v29 = vpop.f32.mrf.mxu1  ;;  %v2534_v36 = vrot.slane %v2532_v10, 5 }
 0x130   : > { %v1533_v42 = vpop.f32.mrf.mxu0  ;;  %v1173_v8 = vadd.f32 %v1172_v29, %v880_v19  ;;  %v2531_v26 = vrot.slane %v2529_v40, 4 }
 0x131   : > { %v5254_v33 = vadd.f32 %v1533_v42, %v1141_v7  ;;  %v3878_v28 = vpop.f32.mrf.mxu1 }
 0x132   : > { %v3904_v25 = vpop.f32.mrf.mxu0  ;;  %v1184_v31 = vadd.f32 %v3878_v28, %v3844_v50  ;;  %v2542_v50 = vshrl.u32 %v5209_v3, 16 }
 0x133   : > { %v5256_v58 = vadd.f32 %v3904_v25, %v1152_v47  ;;  %v1175_v17 = vpop.f32.mrf.mxu1  ;;  %v5281_v25 = vld [vmem:[%s4323_s6 + $0xd4] sm:$0x1] }
 0x134   : > { %v1536_v55 = vpop.f32.mrf.mxu0  ;;  %v1176_v43 = vadd.f32 %v1175_v17, %v883_v45 }
 0x135   : > { %v5258_v5 = vadd.f32 %v1536_v55, %v1144_v0  ;;  %v3881_v6 = vpop.f32.mrf.mxu1  ;;  %4084 = vmatmul.mubr.msk.bf16.gmra.mxu1 %vm745_vm3, %v5884_v59  ;;  %v2538_v0 = vshll.u32 %v5209_v3, 16 }
 0x136   : > { %v3907_v51 = vpop.f32.mrf.mxu0  ;;  %4110 = vmatmul.mubr.msk.bf16.gmra.mxu0 %vm745_vm3, %v4919_v57  ;;  %v1197_v19 = vadd.f32 %v3881_v6, %v5213_v4  ;;  %4087 = vmatprep.mubr.msk.bf16.mxu1 %vm745_vm3, %v5885_v27  ;;  %v2544_v27 = vrot.slane %v2542_v50, 4 }
 0x137   : > { %v5268_v7 = vadd.f32 %v3907_v51, %v1165_v49  ;;  %4113 = vmatprep.mubr.msk.bf16.mxu0 %vm745_vm3, %v4925_v9  ;;  %v1188_v45 = vpop.f32.mrf.mxu1  ;;  %v2540_v29 = vrot.slane %v2538_v0, 5 }
 0x138   : > { %v1549_v59 = vpop.f32.mrf.mxu0 }
 0x139   : > { %v5275_v47 = vadd.f32 %v1549_v59, %v1157_v15  ;;  %v3882_v57 = vpop.f32.mrf.mxu1 }
 0x13a   : > { %v3908_v46 = vpop.f32.mrf.mxu0  ;;  %v1200_v4 = vadd.f32 %v3882_v57, %v5224_v37  ;;  %v2535_v37 = vor.u32 %v2534_v36, %v2531_v26 }
 0x13b   : > { %v5278_v49 = vadd.f32 %v3908_v46, %v1168_v53  ;;  %v1191_v42 = vpop.f32.mrf.mxu1 }
 0x13c   : > { %v1552_v28 = vpop.f32.mrf.mxu0  ;;  %v1192_v9 = vadd.f32 %v1191_v42, %v5226_v35  ;;  %v2545_v35 = vor.u32 %v2544_v27, %v2540_v29  ;;  %v2536_v50 = vrot.slane %v2535_v37, 4  ;;  %v2759_v37 = vrot.slane %v5209_v3, 5 }
 0x13d   : > { %v5284_v17 = vadd.f32 %v1552_v28, %v1160_v34  ;;  %v3885_v15 = vpop.f32.mrf.mxu1  ;;  %4088 = vmatmul.mubr.msk.bf16.gmra.mxu1 %vm745_vm3, %v5886_v14  ;;  %v2548_v34 = vshll.u32 %v5281_v25, 16  ;;  %v3635_v3 = vrot.slane %v5206_v24, 9  ;;  %v5896_v24 = vld [vmem:[#allocation25_spill] sm:$0xff] }
 0x13e   : > { %v3911_v55 = vpop.f32.mrf.mxu0  ;;  %4114 = vmatmul.mubr.msk.bf16.gmra.mxu0 %vm745_vm3, %v4953_v38  ;;  %4091 = vmatprep.mubr.msk.bf16.mxu1 %vm745_vm3, %v5887_v56 }
 0x13f   : > { %v5290_v53 = vadd.f32 %v3911_v55, %v1181_v60  ;;  %4117 = vmatprep.mubr.msk.bf16.mxu0 %vm745_vm3, %v4955_v44  ;;  %v1204_v40 = vpop.f32.mrf.mxu1  ;;  %v2546_v60 = vrot.slane %v2545_v35, 4  ;;  %v2550_v0 = vrot.slane %v2548_v34, 5 }
 0x140   : > { %v1565_v10 = vpop.f32.mrf.mxu0 }
 0x141   : > { %v5297_v6 = vadd.f32 %v1565_v10, %v1173_v8  ;;  %v3886_v14 = vpop.f32.mrf.mxu1  ;;  %v2541_v8 = vsel %vm4372_vm4, %v2536_v50, %v2540_v29 }
 0x142   : > { %v3912_v51 = vpop.f32.mrf.mxu0 }
 0x143   : > { %v5299_v38 = vadd.f32 %v3912_v51, %v1184_v31  ;;  %v1207_v59 = vpop.f32.mrf.mxu1  ;;  %v1189_v31 = vadd.f32 %v1188_v45, %v5222_v61  ;;  %v1213_v45 = vadd.f32 %v3885_v15, %v5128_v62 }
 0x144   : > { %v1568_v57 = vpop.f32.mrf.mxu0 }
 0x145   : > { %v5301_v56 = vadd.f32 %v1568_v57, %v1176_v43  ;;  %v3889_v46 = vpop.f32.mrf.mxu1  ;;  %4092 = vmatmul.mubr.msk.bf16.gmra.mxu1 %vm745_vm3, %v5888_v22  ;;  %v2551_v43 = vsel %vm4372_vm4, %v2546_v60, %v2550_v0 }
 0x146   : > { %v3915_v44 = vpop.f32.mrf.mxu0  ;;  %4118 = vmatmul.mubr.msk.bf16.gmra.mxu0 %vm745_vm3, %v4978_v2  ;;  %4095 = vmatprep.mubr.msk.bf16.mxu1 %vm745_vm3, %v5105_v52  ;;  %v3618_v29 = vcombine.low %v2541_v8, %v2551_v43 }
 0x147   : > { %v5310_v26 = vadd.f32 %v3915_v44, %v1197_v19  ;;  %4121 = vmatprep.mubr.msk.bf16.mxu0 %vm745_vm3, %v4980_v16  ;;  %v1220_v22 = vpop.f32.mrf.mxu1 }
 0x148   : > { %v1581_v36 = vpop.f32.mrf.mxu0 }
 0x149   : > { %v5318_v27 = vadd.f32 %v1581_v36, %v1189_v31  ;;  %v3890_v2 = vpop.f32.mrf.mxu1 }
 0x14a   : > { %v3916_v42 = vpop.f32.mrf.mxu0 }
 0x14b   : > { %v5320_v28 = vadd.f32 %v3916_v42, %v1200_v4  ;;  %v1223_v61 = vpop.f32.mrf.mxu1  ;;  %v1205_v4 = vadd.f32 %v1204_v40, %v5134_v12  ;;  %v2761_v12 = vrot.slane %v2759_v37, 4  ;;  %v5899_v42 = vld [vmem:[#allocation3_spill] sm:$0xff] }
 0x14c   : > { %v1584_v19 = vpop.f32.mrf.mxu0  ;;  %v1224_v52 = vadd.f32 %v1223_v61, %v5177_v18 }
 0x14d   : > { %v5324_v55 = vadd.f32 %v1584_v19, %v1192_v9  ;;  %v3893_v16 = vpop.f32.mrf.mxu1  ;;  %4096 = vmatmul.mubr.msk.bf16.gmra.mxu1 %vm745_vm3, %v3618_v29  ;;  %v1216_v9 = vadd.f32 %v3886_v14, %v5140_v48  ;;  %v5894_v48 = vld [vmem:[#allocation4_spill] sm:$0xff]  ;;  %v5900_v19 = vld [vmem:[#allocation7_spill] sm:$0xff] }
 0x14e   : > { %v3919_v32 = vpop.f32.mrf.mxu0  ;;  %4122 = vmatmul.mubr.msk.bf16.gmra.mxu0 %vm745_vm3, %v4996_v30  ;;  %v1245_v35 = vadd.f32 %v3893_v16, %v5181_v63  ;;  %v1208_v63 = vadd.f32 %v1207_v59, %v5146_v39  ;;  %v1229_v14 = vadd.f32 %v3889_v46, %v5894_v48  ;;  %v5898_v59 = vld [vmem:[#allocation9_spill] sm:$0xff] }
 0x14f   : > { %v5332_v34 = vadd.f32 %v3919_v32, %v1213_v45  ;;  %4125 = vmatprep.mubr.msk.bf16.mxu0 %vm745_vm3, %v4904_v1  ;;  %v1236_v62 = vpop.f32.mrf.mxu1  ;;  %v2762_v1 = vrot.slane %v5281_v25, 5  ;;  %v1221_v43 = vadd.f32 %v1220_v22, %v5898_v59  ;;  %v1232_v45 = vadd.f32 %v3890_v2, %v5900_v19 }
 0x150   : > { %v1597_v18 = vpop.f32.mrf.mxu0  ;;  %v1237_v15 = vadd.f32 %v1236_v62, %v5191_v20  ;;  %v5895_v20 = vld [vmem:[#allocation13_spill] sm:$0xff] }
 0x151   : > { %v5338_v10 = vadd.f32 %v1597_v18, %v1205_v4  ;;  %v3894_v30 = vpop.f32.mrf.mxu1  ;;  %v2763_v46 = vsel %vm4720_vm7, %v2761_v12, %v2762_v1 }
 0x152   : > { %v3920_v51 = vpop.f32.mrf.mxu0  ;;  %v1248_v40 = vadd.f32 %v3894_v30, %v5193_v11  ;;  %v2760_v11 = vsel %vm4720_vm7, %v3635_v3, %v2759_v37 }
 0x153   : > { %v5343_v50 = vadd.f32 %v3920_v51, %v1216_v9  ;;  %v1239_v60 = vpop.f32.mrf.mxu1  ;;  %v3637_v4 = vcombine.low %v2760_v11, %v2763_v46 }
 0x154   : > { %v1600_v0 = vpop.f32.mrf.mxu0  ;;  %v1240_v57 = vadd.f32 %v1239_v60, %v5895_v20 }
 0x155   : > { %v5348_v44 = vadd.f32 %v1600_v0, %v1208_v63  ;;  %v3933_v31 = vpop.f32.mrf.mxu1 }
 0x156   : > { %v3923_v8 = vpop.f32.mrf.mxu0  ;;  %4126 = vmatmul.mubr.msk.bf16.gmra.mxu0 %vm745_vm3, %v5896_v24  ;;  %v1852_v25 = vadd.f32 %v3933_v31, %v5232_v41 }
 0x157   : > { %v5355_v36 = vadd.f32 %v3923_v8, %v1229_v14  ;;  %4129 = vmatprep.mubr.msk.bf16.mxu0 %vm745_vm3, %v5899_v42  ;;  %v1723_v61 = vpop.f32.mrf.mxu1 }
 0x158   : > { %v1613_v29 = vpop.f32.mrf.mxu0  ;;  %v1850_v32 = vadd.f32 %v1723_v61, %v5238_v13 }
 0x159   : > { %v5363_v16 = vadd.f32 %v1613_v29, %v1221_v43  ;;  %v3934_v22 = vpop.f32.mrf.mxu1 }
 0x15a   : > { %v3924_v37 = vpop.f32.mrf.mxu0  ;;  %v1853_v41 = vadd.f32 %v3934_v22, %v5240_v23 }
 0x15b   : > { %v5366_v62 = vadd.f32 %v3924_v37, %v1232_v45  ;;  %v1726_v9 = vpop.f32.mrf.mxu1 }
 0x15c   : > { %v1616_v18 = vpop.f32.mrf.mxu0  ;;  %v1851_v51 = vadd.f32 %v1726_v9, %v5242_v21 }
 0x15d   : > { %v5369_v30 = vadd.f32 %v1616_v18, %v1224_v52  ;;  %v3937_v12 = vpop.f32.mrf.mxu1 }
 0x15e   : > { %v3927_v3 = vpop.f32.mrf.mxu0  ;;  %4130 = vmatmul.mubr.msk.bf16.gmra.mxu0 %vm745_vm3, %v3637_v4  ;;  %v1856_v13 = vadd.f32 %v3937_v12, %v5248_v54 }
 0x15f   : > { %v5373_v2 = vadd.f32 %v3927_v3, %v1245_v35  ;;  %v1739_v1 = vpop.f32.mrf.mxu1 }
 0x160   : > { %v1629_v63 = vpop.f32.mrf.mxu0  ;;  %v1854_v23 = vadd.f32 %v1739_v1, %v5254_v33 }
 0x161   : > { %v5376_v60 = vadd.f32 %v1629_v63, %v1237_v15  ;;  %v3938_v48 = vpop.f32.mrf.mxu1 }
 0x162   : > { %v3928_v0 = vpop.f32.mrf.mxu0  ;;  %v1857_v21 = vadd.f32 %v3938_v48, %v5256_v58 }
 0x163   : > { %v5379_v52 = vadd.f32 %v3928_v0, %v1248_v40  ;;  %v1742_v20 = vpop.f32.mrf.mxu1 }
 0x164   : > { %v1632_v14 = vpop.f32.mrf.mxu0  ;;  %v1855_v35 = vadd.f32 %v1742_v20, %v5258_v5 }
 0x165   : > { %v5382_v8 = vadd.f32 %v1632_v14, %v1240_v57  ;;  %v3941_v31 = vpop.f32.mrf.mxu1 }
 0x166   : > { %v3967_v54 = vpop.f32.mrf.mxu0  ;;  %v1860_v24 = vadd.f32 %v3941_v31, %v5268_v7 }
 0x167   : > { %v5386_v15 = vadd.f32 %v3967_v54, %v1852_v25  ;;  %v1755_v39 = vpop.f32.mrf.mxu1 }
 0x168   : > { %v1951_v33 = vpop.f32.mrf.mxu0  ;;  %v1858_v11 = vadd.f32 %v1755_v39, %v5275_v47 }
 0x169   : > { %v5389_v40 = vadd.f32 %v1951_v33, %v1850_v32  ;;  %v3942_v59 = vpop.f32.mrf.mxu1 }
 0x16a   : > { %v3968_v58 = vpop.f32.mrf.mxu0  ;;  %v1861_v43 = vadd.f32 %v3942_v59, %v5278_v49 }
 0x16b   : > { %v5392_v57 = vadd.f32 %v3968_v58, %v1853_v41  ;;  %v1758_v42 = vpop.f32.mrf.mxu1 }
 0x16c   : > { %v1954_v5 = vpop.f32.mrf.mxu0  ;;  %v1859_v46 = vadd.f32 %v1758_v42, %v5284_v17 }
 0x16d   : > { %v5395_v29 = vadd.f32 %v1954_v5, %v1851_v51  ;;  %v3945_v7 = vpop.f32.mrf.mxu1 }
 0x16e   : > { %v3971_v25 = vpop.f32.mrf.mxu0  ;;  %v1864_v61 = vadd.f32 %v3945_v7, %v5290_v53 }
 0x16f   : > { %v5398_v19 = vadd.f32 %v3971_v25, %v1856_v13  ;;  %v1771_v47 = vpop.f32.mrf.mxu1  ;;  %v4253_v25 = vmov 0.0  }
 0x170   : > { %v1967_v45 = vpop.f32.mrf.mxu0  ;;  %v1862_v32 = vadd.f32 %v1771_v47, %v5297_v6  ;;  %4133 = vmatprep.subr.mxu1 %v4253_v25  ;;  %4165 = vmatprep.mubr.msk.f32.mxu1 %vm4254_vm8, %v4253_v25 }
 0x171   : > { %v5401_v37 = vadd.f32 %v1967_v45, %v1854_v23  ;;  %v3946_v49 = vpop.f32.mrf.mxu1 }
 0x172   : > { %v3972_v22 = vpop.f32.mrf.mxu0  ;;  %v1865_v4 = vadd.f32 %v3946_v49, %v5299_v38  ;;  %v3265_v49 = vld [vmem:[%s5794_s3 + $0x70] sm:$0xff] }
 0x173   : > { %v5404_v41 = vadd.f32 %v3972_v22, %v1857_v21  ;;  %v1774_v17 = vpop.f32.mrf.mxu1 }
 0x174   : > { %v1970_v18 = vpop.f32.mrf.mxu0  ;;  %v1863_v9 = vadd.f32 %v1774_v17, %v5301_v56 }
 0x175   : > { %v5407_v51 = vadd.f32 %v1970_v18, %v1855_v35  ;;  %v3949_v53 = vpop.f32.mrf.mxu1 }
 0x176   : > { %v3975_v3 = vpop.f32.mrf.mxu0  ;;  %v1868_v12 = vadd.f32 %v3949_v53, %v5310_v26 }
 0x177   : > { %v5410_v13 = vadd.f32 %v3975_v3, %v1860_v24  ;;  %v1787_v6 = vpop.f32.mrf.mxu1 }
 0x178   : > { %v1983_v63 = vpop.f32.mrf.mxu0  ;;  %v1866_v1 = vadd.f32 %v1787_v6, %v5318_v27  ;;  %v3264_v6 = vld [vmem:[%s5794_s3 + $0x68] sm:$0xff] }
 0x179   : > { %v5413_v23 = vadd.f32 %v1983_v63, %v1858_v11  ;;  %v3950_v38 = vpop.f32.mrf.mxu1 }
 0x17a   : > { %v3976_v0 = vpop.f32.mrf.mxu0  ;;  %v1869_v48 = vadd.f32 %v3950_v38, %v5320_v28 }
 0x17b   : > { %v5416_v21 = vadd.f32 %v3976_v0, %v1861_v43  ;;  %v1790_v56 = vpop.f32.mrf.mxu1 }
 0x17c   : > { %v1986_v14 = vpop.f32.mrf.mxu0  ;;  %v1867_v20 = vadd.f32 %v1790_v56, %v5324_v55 }
 0x17d   : > { %v5419_v35 = vadd.f32 %v1986_v14, %v1859_v46  ;;  %v3953_v26 = vpop.f32.mrf.mxu1  ;;  %v3263_v14 = vld [vmem:[%s5794_s3 + $0x60] sm:$0xff] }
 0x17e   : > { %v3979_v31 = vpop.f32.mrf.mxu0  ;;  %v1872_v54 = vadd.f32 %v3953_v26, %v5332_v34  ;;  %v3266_v34 = vld [vmem:[%s5794_s3 + $0x78] sm:$0xff] }
 0x17f   : > { %v5422_v24 = vadd.f32 %v3979_v31, %v1864_v61  ;;  %v1803_v27 = vpop.f32.mrf.mxu1  ;;  %4134 = vmatpush3.msra.mxu1 %v3266_v34  ;;  %v3261_v34 = vld [vmem:[%s5794_s3 + $0x50] sm:$0xff] }
 0x180   : > { %v1999_v39 = vpop.f32.mrf.mxu0  ;;  %v1870_v33 = vadd.f32 %v1803_v27, %v5338_v10  ;;  %4135 = vmatprep.subr.mxu1 %v4253_v25 }
 0x181   : > { %v5425_v11 = vadd.f32 %v1999_v39, %v1862_v32  ;;  %v3954_v28 = vpop.f32.mrf.mxu1  ;;  %4136 = vmatpush3.msra.mxu1 %v3265_v49 }
 0x182   : > { %v3980_v59 = vpop.f32.mrf.mxu0  ;;  %v1873_v58 = vadd.f32 %v3954_v28, %v5343_v50  ;;  %4137 = vmatprep.subr.mxu1 %v4253_v25 }
 0x183   : > { %v5428_v43 = vadd.f32 %v3980_v59, %v1865_v4  ;;  %v1806_v55 = vpop.f32.mrf.mxu1  ;;  %4138 = vmatpush3.msra.mxu1 %v3264_v6 }
 0x184   : > { %v2002_v42 = vpop.f32.mrf.mxu0  ;;  %v1871_v5 = vadd.f32 %v1806_v55, %v5348_v44  ;;  %4139 = vmatprep.subr.mxu1 %v4253_v25 }
 0x185   : > { %v5431_v46 = vadd.f32 %v2002_v42, %v1863_v9  ;;  %v3957_v7 = vpop.f32.mrf.mxu1  ;;  %4140 = vmatpush3.msra.mxu1 %v3263_v14 }
 0x186   : > { %v3983_v10 = vpop.f32.mrf.mxu0  ;;  %v1876_v61 = vadd.f32 %v3957_v7, %v5355_v36  ;;  %4141 = vmatprep.subr.mxu1 %v4253_v25 }
 0x187   : > { %v5438_v50 = vadd.f32 %v3983_v10, %v1868_v12  ;;  %v1819_v47 = vpop.f32.mrf.mxu1 }
 0x188   : > { %v2015_v45 = vpop.f32.mrf.mxu0  ;;  %v1874_v44 = vadd.f32 %v1819_v47, %v5363_v16 }
 0x189   : > { %v5442_v32 = vadd.f32 %v2015_v45, %v1866_v1  ;;  %v3958_v22 = vpop.f32.mrf.mxu1 }
 0x18a   : > { %v3984_v4 = vpop.f32.mrf.mxu0  ;;  %v1877_v36 = vadd.f32 %v3958_v22, %v5366_v62 }
 0x18b   : > { %v5448_v17 = vadd.f32 %v3984_v4, %v1869_v48  ;;  %v1822_v18 = vpop.f32.mrf.mxu1 }
 0x18c   : > { %v2018_v9 = vpop.f32.mrf.mxu0  ;;  %v1875_v53 = vadd.f32 %v1822_v18, %v5369_v30 }
 0x18d   : > { %v5452_v16 = vadd.f32 %v2018_v9, %v1867_v20  ;;  %v3961_v3 = vpop.f32.mrf.mxu1 }
 0x18e   : > { %v3987_v12 = vpop.f32.mrf.mxu0  ;;  %v1880_v63 = vadd.f32 %v3961_v3, %v5373_v2 }
 0x18f   : > { %v5458_v1 = vadd.f32 %v3987_v12, %v1872_v54  ;;  %v1835_v62 = vpop.f32.mrf.mxu1 }
 0x190   : > { %v2031_v38 = vpop.f32.mrf.mxu0  ;;  %v1878_v0 = vadd.f32 %v1835_v62, %v5376_v60 }
 0x191   : > { %v5462_v30 = vadd.f32 %v2031_v38, %v1870_v33  ;;  %v3962_v48 = vpop.f32.mrf.mxu1  ;;  %v3262_v33 = vld [vmem:[%s5794_s3 + $0x58] sm:$0xff] }
 0x192   : > { %v3988_v56 = vpop.f32.mrf.mxu0  ;;  %v1881_v20 = vadd.f32 %v3962_v48, %v5379_v52  ;;  %4142 = vmatpush3.msra.mxu1 %v3262_v33 }
 0x193   : > { %v5468_v2 = vadd.f32 %v3988_v56, %v1873_v58  ;;  %v1838_v26 = vpop.f32.mrf.mxu1  ;;  %4143 = vmatprep.subr.mxu1 %v4253_v25 }
 0x194   : > { %v2034_v31 = vpop.f32.mrf.mxu0  ;;  %v1879_v54 = vadd.f32 %v1838_v26, %v5382_v8  ;;  %4144 = vmatpush3.msra.mxu1 %v3261_v34 }
 0x195   : > { %v5472_v60 = vadd.f32 %v2034_v31, %v1871_v5  ;;  %v4001_v39 = vpop.f32.mrf.mxu1  ;;  %4145 = vmatprep.subr.mxu1 %v4253_v25 }
 0x196   : > { %v3991_v27 = vpop.f32.mrf.mxu0  ;;  %v2292_v52 = vadd.f32 %v4001_v39, %v5386_v15 }
 0x197   : > { %5901 = vst [vmem:[#allocation12_spill] sm:$0xff] %v5472_v60  ;;  %v5477_v28 = vadd.f32 %v3991_v27, %v1876_v61  ;;  %v2163_v58 = vpop.f32.mrf.mxu1 }
 0x198   : > { %v2047_v59 = vpop.f32.mrf.mxu0  ;;  %v2290_v8 = vadd.f32 %v2163_v58, %v5389_v40 }
 0x199   : > { %v5481_v55 = vadd.f32 %v2047_v59, %v1874_v44  ;;  %v4002_v5 = vpop.f32.mrf.mxu1  ;;  %v3260_v44 = vld [vmem:[%s5794_s3 + $0x48] sm:$0xff] }
 0x19a   : > { %v3992_v42 = vpop.f32.mrf.mxu0  ;;  %v2293_v10 = vadd.f32 %v4002_v5, %v5392_v57  ;;  %4146 = vmatpush3.msra.mxu1 %v3260_v44 }
 0x19b   : > { %5902 = vst [vmem:[#allocation5_spill] sm:$0xff] %v5481_v55  ;;  %v5487_v7 = vadd.f32 %v3992_v42, %v1877_v36  ;;  %v5490_v61 = vpop.f32.mrf.mxu1  ;;  %4147 = vmatprep.subr.mxu1 %v4253_v25 }
 0x19c   : > { %v2050_v15 = vpop.f32.mrf.mxu0 }
 0x19d   : > { %v5493_v47 = vadd.f32 %v2050_v15, %v1875_v53  ;;  %v4005_v40 = vpop.f32.mrf.mxu1  ;;  %v3259_v53 = vld [vmem:[%s5794_s3 + $0x40] sm:$0xff] }
 0x19e   : > { %v3995_v45 = vpop.f32.mrf.mxu0  ;;  %v2296_v22 = vadd.f32 %v4005_v40, %v5398_v19  ;;  %4148 = vmatpush3.msra.mxu1 %v3259_v53 }
 0x19f   : > { %5903 = vst [vmem:[#allocation10_spill] sm:$0xff] %v5493_v47  ;;  %v5498_v49 = vadd.f32 %v3995_v45, %v1880_v63  ;;  %v5501_v4 = vpop.f32.mrf.mxu1  ;;  %4149 = vmatprep.subr.mxu1 %v4253_v25 }
 0x1a0   : > { %v2063_v57 = vpop.f32.mrf.mxu0 }
 0x1a1   : > { %v5504_v36 = vadd.f32 %v2063_v57, %v1878_v0  ;;  %v4006_v9 = vpop.f32.mrf.mxu1  ;;  %v3258_v0 = vld [vmem:[%s5794_s3 + $0x38] sm:$0xff]  ;;  %v3255_v57 = vld [vmem:[%s5794_s3 + $0x20] sm:$0xff] }
 0x1a2   : > { %v3996_v18 = vpop.f32.mrf.mxu0  ;;  %v2297_v12 = vadd.f32 %v4006_v9, %v5404_v41  ;;  %4150 = vmatpush3.msra.mxu1 %v3258_v0 }
 0x1a3   : > { %5904 = vst [vmem:[#allocation15_spill] sm:$0xff] %v5504_v36  ;;  %v5509_v3 = vadd.f32 %v3996_v18, %v1881_v20  ;;  %v5512_v6 = vpop.f32.mrf.mxu1  ;;  %4151 = vmatprep.subr.mxu1 %v4253_v25 }
 0x1a4   : > { %v2066_v19 = vpop.f32.mrf.mxu0 }
 0x1a5   : > { %v5515_v63 = vadd.f32 %v2066_v19, %v1879_v54  ;;  %v4009_v62 = vpop.f32.mrf.mxu1  ;;  %v3257_v54 = vld [vmem:[%s5794_s3 + $0x30] sm:$0xff] }
 0x1a6   : > { %v4035_v38 = vpop.f32.mrf.mxu0  ;;  %v2300_v48 = vadd.f32 %v4009_v62, %v5410_v13  ;;  %4152 = vmatpush3.msra.mxu1 %v3257_v54 }
 0x1a7   : > { %5905 = vst [vmem:[#allocation8_spill] sm:$0xff] %v5515_v63  ;;  %v5521_v56 = vadd.f32 %v4035_v38, %v2292_v52  ;;  %v5523_v41 = vpop.f32.mrf.mxu1  ;;  %4153 = vmatprep.subr.mxu1 %v4253_v25 }
 0x1a8   : > { %v2369_v14 = vpop.f32.mrf.mxu0 }
 0x1a9   : > { %v5526_v20 = vadd.f32 %v2369_v14, %v2290_v8  ;;  %v4010_v26 = vpop.f32.mrf.mxu1 }
 0x1aa   : > { %v4036_v31 = vpop.f32.mrf.mxu0  ;;  %v2301_v27 = vadd.f32 %v4010_v26, %v5416_v21  ;;  %v3252_v26 = vld [vmem:[%s5794_s3 + $0x8] sm:$0xff] }
 0x1ab   : > { %v5532_v39 = vadd.f32 %v4036_v31, %v2293_v10  ;;  %v5534_v13 = vpop.f32.mrf.mxu1 }
 0x1ac   : > { %v5536_v33 = vpop.f32.mrf.mxu0 }
 0x1ad   : > { %v4013_v52 = vpop.f32.mrf.mxu1 }
 0x1ae   : > { %v4039_v59 = vpop.f32.mrf.mxu0  ;;  %v2304_v58 = vadd.f32 %v4013_v52, %v5422_v24  ;;  %v3256_v24 = vld [vmem:[%s5794_s3 + $0x28] sm:$0xff] }
 0x1af   : > { %v5540_v8 = vadd.f32 %v4039_v59, %v2296_v22  ;;  %v5542_v42 = vpop.f32.mrf.mxu1  ;;  %4154 = vmatpush3.msra.mxu1 %v3256_v24 }
 0x1b0   : > { %v5544_v5 = vpop.f32.mrf.mxu0  ;;  %4155 = vmatprep.subr.mxu1 %v4253_v25 }
 0x1b1   : > { %v4014_v21 = vpop.f32.mrf.mxu1  ;;  %4156 = vmatpush3.msra.mxu1 %v3255_v57 }
 0x1b2   : > { %v4040_v34 = vpop.f32.mrf.mxu0  ;;  %v2305_v10 = vadd.f32 %v4014_v21, %v5428_v43  ;;  %4157 = vmatprep.subr.mxu1 %v4253_v25 }
 0x1b3   : > { %v5547_v15 = vadd.f32 %v4040_v34, %v2297_v12  ;;  %v5549_v45 = vpop.f32.mrf.mxu1  ;;  %v3254_v12 = vld [vmem:[%s5794_s3 + $0x18] sm:$0xff] }
 0x1b4   : > { %v5551_v40 = vpop.f32.mrf.mxu0  ;;  %4158 = vmatpush3.msra.mxu1 %v3254_v12 }
 0x1b5   : > { %v4017_v44 = vpop.f32.mrf.mxu1  ;;  %4159 = vmatprep.subr.mxu1 %v4253_v25 }
 0x1b6   : > { %v4043_v22 = vpop.f32.mrf.mxu0  ;;  %v2308_v43 = vadd.f32 %v4017_v44, %v5438_v50  ;;  %v3253_v50 = vld [vmem:[%s5794_s3 + $0x10] sm:$0xff] }
 0x1b7   : > { %v5561_v18 = vadd.f32 %v4043_v22, %v2300_v48  ;;  %v5563_v9 = vpop.f32.mrf.mxu1  ;;  %4160 = vmatpush3.msra.mxu1 %v3253_v50 }
 0x1b8   : > { %v5565_v53 = vpop.f32.mrf.mxu0  ;;  %4161 = vmatprep.subr.mxu1 %v4253_v25 }
 0x1b9   : > { %v4018_v19 = vpop.f32.mrf.mxu1  ;;  %4162 = vmatpush3.msra.mxu1 %v3252_v26 }
 0x1ba   : > { %v4044_v62 = vpop.f32.mrf.mxu0  ;;  %v2309_v38 = vadd.f32 %v4018_v19, %v5448_v17  ;;  %4163 = vmatprep.subr.mxu1 %v4253_v25  ;;  %v3251_v17 = vld [vmem:[%s5794_s3] sm:$0xff] }
 0x1bb   : > { %v5576_v0 = vadd.f32 %v4044_v62, %v2301_v27  ;;  %v5578_v48 = vpop.f32.mrf.mxu1  ;;  %4164 = vmatpush3.msra.mxu1 %v3251_v17 }
 0x1bc   : > { %v5580_v14 = vpop.f32.mrf.mxu0 }
 0x1bd   : > { %v4021_v31 = vpop.f32.mrf.mxu1 }
 0x1be   : > { %v4047_v54 = vpop.f32.mrf.mxu0  ;;  %v2312_v27 = vadd.f32 %v4021_v31, %v5458_v1 }
 0x1bf   : > { %v5591_v52 = vadd.f32 %v4047_v54, %v2304_v58  ;;  %v5594_v59 = vpop.f32.mrf.mxu1 }
 0x1c0   : > { %v5596_v21 = vpop.f32.mrf.mxu0 }
 0x1c1   : > { %v4022_v34 = vpop.f32.mrf.mxu1 }
 0x1c2   : > { %v4048_v24 = vpop.f32.mrf.mxu0  ;;  %v2313_v44 = vadd.f32 %v4022_v34, %v5468_v2 }
 0x1c3   : > { %v5599_v22 = vadd.f32 %v4048_v24, %v2305_v10  ;;  %v5601_v57 = vpop.f32.mrf.mxu1 }
 0x1c4   : > { %5906 = vst [vmem:[#allocation14_spill] sm:$0xff] %v5601_v57  ;;  %v5603_v12 = vpop.f32.mrf.mxu0 }
 0x1c5   : > { %v4025_v1 = vpop.f32.mrf.mxu1 }
 0x1c6   : > { %v4051_v58 = vpop.f32.mrf.mxu0  ;;  %v2316_v19 = vadd.f32 %v4025_v1, %v5477_v28 }
 0x1c7   : > { %v5606_v62 = vadd.f32 %v4051_v58, %v2308_v43  ;;  %v5608_v25 = vpop.f32.mrf.mxu1 }
 0x1c8   : > { %5907 = vst [vmem:[#allocation17_spill] sm:$0xff] %v5608_v25  ;;  %v5610_v50 = vpop.f32.mrf.mxu0 }
 0x1c9   : > { %v4026_v26 = vpop.f32.mrf.mxu1 }
 0x1ca   : > { %v4052_v31 = vpop.f32.mrf.mxu0  ;;  %v2317_v2 = vadd.f32 %v4026_v26, %v5487_v7 }
 0x1cb   : > { %v5613_v10 = vadd.f32 %v4052_v31, %v2309_v38  ;;  %v5615_v54 = vpop.f32.mrf.mxu1 }
 0x1cc   : > { %5908 = vst [vmem:[#allocation19_spill] sm:$0xff] %v5615_v54  ;;  %v5617_v17 = vpop.f32.mrf.mxu0 }
 0x1cd   : > { %v4029_v34 = vpop.f32.mrf.mxu1 }
 0x1ce   : > { %v4055_v24 = vpop.f32.mrf.mxu0  ;;  %v2320_v28 = vadd.f32 %v4029_v34, %v5498_v49 }
 0x1cf   : > { %v5620_v43 = vadd.f32 %v4055_v24, %v2312_v27  ;;  %v5622_v1 = vpop.f32.mrf.mxu1 }
 0x1d0   : > { %5910 = vst [vmem:[#allocation23_spill] sm:$0xff] %v5622_v1  ;;  %v5624_v58 = vpop.f32.mrf.mxu0 }
 0x1d1   : > { %5909 = vst [vmem:[#allocation21_spill] sm:$0xff] %v5620_v43  ;;  %v4030_v63 = vpop.f32.mrf.mxu1 }
 0x1d2   : > { %v4056_v36 = vpop.f32.mrf.mxu0  ;;  %v2321_v7 = vadd.f32 %v4030_v63, %v5509_v3 }
 0x1d3   : > { %v5627_v38 = vadd.f32 %v4056_v36, %v2313_v44  ;;  %v5629_v26 = vpop.f32.mrf.mxu1 }
 0x1d4   : > { %5912 = vst [vmem:[#allocation11_spill] sm:$0xff] %v5629_v26  ;;  %v5631_v31 = vpop.f32.mrf.mxu0 }
 0x1d5   : > { %5911 = vst [vmem:[#allocation6_spill] sm:$0xff] %v5627_v38  ;;  %5913 = vst [vmem:[#allocation16_spill] sm:$0xff] %v5631_v31  ;;  %v4069_v47 = vpop.f32.mrf.mxu1 }
 0x1d6   : > { %v4059_v54 = vpop.f32.mrf.mxu0 }
 0x1d7   : > { %v5633_v25 = vadd.f32 %v4059_v54, %v2316_v19  ;;  %v2597_v27 = vpop.f32.mrf.mxu1 }
 0x1d8   : > { %v5635_v49 = vpop.f32.mrf.mxu0 }
 0x1d9   : > { %5914 = vst [vmem:[#allocation18_spill] sm:$0xff] %v5633_v25  ;;  %5915 = vst [vmem:[#allocation20_spill] sm:$0xff] %v5635_v49  ;;  %v4070_v24 = vpop.f32.mrf.mxu1 }
 0x1da   : > { %v4060_v34 = vpop.f32.mrf.mxu0 }
 0x1db   : > { %v5637_v1 = vadd.f32 %v4060_v34, %v2317_v2  ;;  %v2600_v3 = vpop.f32.mrf.mxu1  ;;  %v2291_v34 = vadd.f32 %v5490_v61, %v5395_v29  ;;  %v5662_v29 = vld [vmem:[%s5793_s2] ss:$0 sm:$0xff] }
 0x1dc   : > { %v5639_v55 = vpop.f32.mrf.mxu0 }
 0x1dd   : > { %5916 = vst [vmem:[#allocation22_spill] sm:$0xff] %v5637_v1  ;;  %5917 = vst [vmem:[#allocation4_spill] sm:$0xff] %v5639_v55  ;;  %v4073_v63 = vpop.f32.mrf.mxu1  ;;  %v2724_v1 = vadd.f32 %v2597_v27, %v5526_v20 }
 0x1de   : > { %v4063_v36 = vpop.f32.mrf.mxu0 }
 0x1df   : > { %v5641_v44 = vadd.f32 %v4063_v36, %v2320_v28  ;;  %v2613_v38 = vpop.f32.mrf.mxu1 }
 0x1e0   : > { %v5643_v26 = vpop.f32.mrf.mxu0 }
 0x1e1   : > { %5918 = vst [vmem:[#allocation13_spill] sm:$0xff] %v5641_v44  ;;  %5919 = vst [vmem:[#allocation25_spill] sm:$0xff] %v5643_v26  ;;  %v4074_v19 = vpop.f32.mrf.mxu1  ;;  %v2497_v44 = vadd.f32 %v5536_v33, %v2291_v34  ;;  %v2726_v26 = vadd.f32 %v4069_v47, %v5521_v56 }
 0x1e2   : > { %v4064_v43 = vpop.f32.mrf.mxu0 }
 0x1e3   : > { %v5645_v54 = vadd.f32 %v4064_v43, %v2321_v7  ;;  %v2616_v49 = vpop.f32.mrf.mxu1  ;;  %v2725_v57 = vadd.f32 %v2600_v3, %v2497_v44  ;;  %v2730_v44 = vadd.f32 %v4073_v63, %v5540_v8  ;;  %v2298_v8 = vadd.f32 %v5523_v41, %v5413_v23 }
 0x1e4   : > { %v5647_v25 = vpop.f32.mrf.mxu0 }
 0x1e5   : > { %5920 = vst [vmem:[#allocation24_spill] sm:$0xff] %v5645_v54  ;;  %5921 = vst [vmem:[#allocation9_spill] sm:$0xff] %v5647_v25  ;;  %v5649_v31 = vpop.f32.mrf.mxu1  ;;  %v2294_v54 = vadd.f32 %v5501_v4, %v5401_v37  ;;  %v2727_v25 = vadd.f32 %v4070_v24, %v5532_v39  ;;  %v2295_v37 = vadd.f32 %v5512_v6, %v5407_v51 }
 0x1e6   : > { %v4103_v2 = vpop.f32.mrf.mxu0  ;;  %v2731_v51 = vadd.f32 %v4074_v19, %v5547_v15  ;;  %v2299_v15 = vadd.f32 %v5534_v13, %v5419_v35 }
 0x1e7   : > { %v2629_v28 = vpop.f32.mrf.mxu1  ;;  %v2938_v60 = vadd.f32 %v4103_v2, %v2726_v26  ;;  %v2500_v33 = vadd.f32 %v5544_v5, %v2294_v54  ;;  %v2501_v3 = vadd.f32 %v5551_v40, %v2295_v37 }
 0x1e8   : > { %v2809_v36 = vpop.f32.mrf.mxu0  ;;  %v2505_v41 = vadd.f32 %v5580_v14, %v2299_v15 }
 0x1e9   : > { %v2936_v55 = vadd.f32 %v2809_v36, %v2724_v1  ;;  %v4078_v43 = vpop.f32.mrf.mxu1  ;;  %v2728_v26 = vadd.f32 %v2613_v38, %v2500_v33  ;;  %v2977_v27 = vadd.f32 %v5662_v29, %v2938_v60  ;;  %v2729_v6 = vadd.f32 %v2616_v49, %v2501_v3 }
 0x1ea   : > { %v4104_v7 = vpop.f32.mrf.mxu0  ;;  %v2504_v49 = vadd.f32 %v5565_v53, %v2298_v8 }
 0x1eb   : > { %v2632_v61 = vpop.f32.mrf.mxu1  ;;  %v2975_v47 = vadd.f32 %v5662_v29, %v2936_v55  ;;  %v2939_v56 = vadd.f32 %v4104_v7, %v2727_v25  ;;  %v3009_v60 = vmax.f32 %v2977_v27, 0.0 }
 0x1ec   : > { %v2812_v20 = vpop.f32.mrf.mxu0  ;;  %v2733_v14 = vadd.f32 %v2632_v61, %v2505_v41  ;;  %v2306_v41 = vadd.f32 %v5563_v9, %v5442_v32  ;;  %v2307_v9 = vadd.f32 %v5578_v48, %v5452_v16  ;;  %v2310_v48 = vadd.f32 %v5594_v59, %v5462_v30  ;;  %v5923_v30 = vld [vmem:[#allocation14_spill] sm:$0xff] }
 0x1ed   : > { %v2937_v1 = vadd.f32 %v2812_v20, %v2725_v57  ;;  %v5668_v4 = vpop.f32.mrf.mxu1  ;;  %v3007_v55 = vmax.f32 %v2975_v47, 0.0  ;;  %v2978_v57 = vadd.f32 %v5662_v29, %v2939_v56 }
 0x1ee   : > { %v4107_v39 = vpop.f32.mrf.mxu0 }
 0x1ef   : > { %v2976_v24 = vadd.f32 %v5662_v29, %v2937_v1  ;;  %v2645_v5 = vpop.f32.mrf.mxu1  ;;  %v2942_v7 = vadd.f32 %v4107_v39, %v2730_v44  ;;  %v3010_v33 = vmax.f32 %v2978_v57, 0.0  ;;  %v2735_v57 = vadd.f32 %v4078_v43, %v5576_v0 }
 0x1f0   : > { %v2825_v54 = vpop.f32.mrf.mxu0 }
 0x1f1   : > { %v3008_v25 = vmax.f32 %v2976_v24, 0.0  ;;  %v2940_v2 = vadd.f32 %v2825_v54, %v2728_v26  ;;  %v5676_v34 = vpop.f32.mrf.mxu1  ;;  %v2981_v39 = vadd.f32 %v5662_v29, %v2942_v7  ;;  %v2732_v24 = vadd.f32 %v2629_v28, %v2504_v49 }
 0x1f2   : > { %v4108_v38 = vpop.f32.mrf.mxu0  ;;  %v2734_v54 = vadd.f32 %v5649_v31, %v5561_v18 }
 0x1f3   : > { %v3207_v36 = vadd.f32 %v3008_v25, %v3007_v55  ;;  %v2979_v40 = vadd.f32 %v5662_v29, %v2940_v2  ;;  %v2648_v63 = vpop.f32.mrf.mxu1  ;;  %v2943_v56 = vadd.f32 %v4108_v38, %v2731_v51  ;;  %v2302_v55 = vadd.f32 %v5542_v42, %v5425_v11 }
 0x1f4   : > { %v2828_v20 = vpop.f32.mrf.mxu0  ;;  %v3013_v28 = vmax.f32 %v2981_v39, 0.0 }
 0x1f5   : > { %v3208_v47 = vadd.f32 %v3207_v36, %v3009_v60  ;;  %v2941_v1 = vadd.f32 %v2828_v20, %v2729_v6  ;;  %v5684_v19 = vpop.f32.mrf.mxu1  ;;  %v3011_v26 = vmax.f32 %v2979_v40, 0.0  ;;  %v2982_v13 = vadd.f32 %v5662_v29, %v2943_v56 }
 0x1f6   : > { %v4111_v37 = vpop.f32.mrf.mxu0  ;;  %v2508_v60 = vadd.f32 %v5596_v21, %v2302_v55  ;;  %v2303_v21 = vadd.f32 %v5549_v45, %v5431_v46 }
 0x1f7   : > { %v3209_v27 = vadd.f32 %v3208_v47, %v3010_v33  ;;  %v2980_v23 = vadd.f32 %v5662_v29, %v2941_v1  ;;  %v2661_v3 = vpop.f32.mrf.mxu1  ;;  %v2946_v38 = vadd.f32 %v4111_v37, %v2734_v54  ;;  %v3014_v7 = vmax.f32 %v2982_v13, 0.0 }
 0x1f8   : > { %v2841_v44 = vpop.f32.mrf.mxu0  ;;  %v2736_v42 = vadd.f32 %v2645_v5, %v2508_v60  ;;  %v2509_v5 = vadd.f32 %v5603_v12, %v2303_v21 }
 0x1f9   : > { %v3210_v35 = vadd.f32 %v3209_v27, %v3011_v26  ;;  %v3012_v53 = vmax.f32 %v2980_v23, 0.0  ;;  %v2944_v25 = vadd.f32 %v2841_v44, %v2732_v24  ;;  %v5695_v2 = vpop.f32.mrf.mxu1  ;;  %v2985_v20 = vadd.f32 %v5662_v29, %v2946_v38 }
 0x1fa   : > { %v4112_v51 = vpop.f32.mrf.mxu0  ;;  %v2738_v26 = vadd.f32 %v5668_v4, %v5591_v52  ;;  %v2739_v44 = vadd.f32 %v5676_v34, %v5599_v22  ;;  %v2737_v54 = vadd.f32 %v2648_v63, %v2509_v5  ;;  %v5924_v5 = vld [vmem:[#allocation16_spill] sm:$0xff] }
 0x1fb   : > { %v3211_v6 = vadd.f32 %v3210_v35, %v3012_v53  ;;  %v2983_v18 = vadd.f32 %v5662_v29, %v2944_v25  ;;  %v2664_v31 = vpop.f32.mrf.mxu1  ;;  %v2947_v8 = vadd.f32 %v4112_v51, %v2735_v57  ;;  %v3017_v24 = vmax.f32 %v2985_v20, 0.0 }
 0x1fc   : > { %v2844_v36 = vpop.f32.mrf.mxu0  ;;  %v2512_v53 = vadd.f32 %v5610_v50, %v2306_v41  ;;  %v2513_v50 = vadd.f32 %v5617_v17, %v2307_v9  ;;  %v5925_v41 = vld [vmem:[#allocation21_spill] sm:$0xff] }
 0x1fd   : > { %v3212_v40 = vadd.f32 %v3211_v6, %v3013_v28  ;;  %v2945_v11 = vadd.f32 %v2844_v36, %v2733_v14  ;;  %v5699_v0 = vpop.f32.mrf.mxu1  ;;  %v3015_v61 = vmax.f32 %v2983_v18, 0.0  ;;  %v2986_v49 = vadd.f32 %v5662_v29, %v2947_v8 }
 0x1fe   : > { %v4115_v43 = vpop.f32.mrf.mxu0  ;;  %v2740_v51 = vadd.f32 %v2661_v3, %v2512_v53  ;;  %v2742_v18 = vadd.f32 %v5684_v19, %v5606_v62  ;;  %v2743_v3 = vadd.f32 %v5695_v2, %v5613_v10  ;;  %v2516_v62 = vadd.f32 %v5624_v58, %v2310_v48 }
 0x1ff   : > { %v3213_v33 = vadd.f32 %v3212_v40, %v3014_v7  ;;  %v2984_v47 = vadd.f32 %v5662_v29, %v2945_v11  ;;  %v2677_v56 = vpop.f32.mrf.mxu1  ;;  %v2950_v35 = vadd.f32 %v4115_v43, %v2738_v26  ;;  %v3018_v52 = vmax.f32 %v2986_v49, 0.0 }
 0x200   : > { %v2857_v1 = vpop.f32.mrf.mxu0  ;;  %v2741_v40 = vadd.f32 %v2664_v31, %v2513_v50 }
 0x201   : > { %v3214_v15 = vadd.f32 %v3213_v33, %v3015_v61  ;;  %v3016_v37 = vmax.f32 %v2984_v47, 0.0  ;;  %v2948_v39 = vadd.f32 %v2857_v1, %v2736_v42  ;;  %v5709_v27 = vpop.f32.mrf.mxu1  ;;  %v2989_v22 = vadd.f32 %v5662_v29, %v2950_v35  ;;  %v5922_v1 = vld [vmem:[#allocation12_spill] sm:$0xff] }
 0x202   : > { %v4116_v23 = vpop.f32.mrf.mxu0  ;;  %v2311_v59 = vadd.f32 %v5923_v30, %v5922_v1 }
 0x203   : > { %v3215_v46 = vadd.f32 %v3214_v15, %v3016_v37  ;;  %v2987_v45 = vadd.f32 %v5662_v29, %v2948_v39  ;;  %v2680_v13 = vpop.f32.mrf.mxu1  ;;  %v2951_v55 = vadd.f32 %v4116_v23, %v2739_v44  ;;  %v3021_v8 = vmax.f32 %v2989_v22, 0.0 }
 0x204   : > { %v2860_v12 = vpop.f32.mrf.mxu0  ;;  %v2744_v15 = vadd.f32 %v2677_v56, %v2516_v62  ;;  %v2517_v26 = vadd.f32 %v5924_v5, %v2311_v59  ;;  %v5926_v56 = vld [vmem:[#allocation5_spill] sm:$0xff] }
 0x205   : > { %v3216_v4 = vadd.f32 %v3215_v46, %v3017_v24  ;;  %v2949_v57 = vadd.f32 %v2860_v12, %v2737_v54  ;;  %v5717_v25 = vpop.f32.mrf.mxu1  ;;  %v3019_v14 = vmax.f32 %v2987_v45, 0.0  ;;  %v2990_v36 = vadd.f32 %v5662_v29, %v2951_v55  ;;  %v5927_v54 = vld [vmem:[#allocation17_spill] sm:$0xff]  ;;  %v5928_v12 = vld [vmem:[#allocation6_spill] sm:$0xff] }
 0x206   : > { %v4119_v32 = vpop.f32.mrf.mxu0  ;;  %v2746_v24 = vadd.f32 %v5699_v0, %v5925_v41  ;;  %v2314_v35 = vadd.f32 %v5927_v54, %v5926_v56  ;;  %v2747_v53 = vadd.f32 %v5709_v27, %v5928_v12 }
 0x207   : > { %v3217_v28 = vadd.f32 %v3216_v4, %v3018_v52  ;;  %v2988_v34 = vadd.f32 %v5662_v29, %v2949_v57  ;;  %v2693_v63 = vpop.f32.mrf.mxu1  ;;  %v2954_v42 = vadd.f32 %v4119_v32, %v2742_v18  ;;  %v3022_v61 = vmax.f32 %v2990_v36, 0.0 }
 0x208   : > { %v2873_v6 = vpop.f32.mrf.mxu0  ;;  %v2745_v52 = vadd.f32 %v2680_v13, %v2517_v26 }
 0x209   : > { %v3218_v38 = vadd.f32 %v3217_v28, %v3019_v14  ;;  %v2952_v60 = vadd.f32 %v2873_v6, %v2740_v51  ;;  %v3020_v7 = vmax.f32 %v2988_v34, 0.0  ;;  %v4094_v43 = vpop.f32.mrf.mxu1  ;;  %v2993_v2 = vadd.f32 %v5662_v29, %v2954_v42  ;;  %v5929_v14 = vld [vmem:[#allocation20_spill] sm:$0xff] }
 0x20a   : > { %v4120_v16 = vpop.f32.mrf.mxu0  ;;  %v2520_v0 = vadd.f32 %v5929_v14, %v2314_v35 }
 0x20b   : > { %v3219_v11 = vadd.f32 %v3218_v38, %v3020_v7  ;;  %v2991_v17 = vadd.f32 %v5662_v29, %v2952_v60  ;;  %v2955_v47 = vadd.f32 %v4120_v16, %v2743_v3  ;;  %v2696_v37 = vpop.f32.mrf.mxu1  ;;  %v3025_v4 = vmax.f32 %v2993_v2, 0.0  ;;  %v5930_v38 = vld [vmem:[#allocation10_spill] sm:$0xff]  ;;  %v5931_v60 = vld [vmem:[#allocation19_spill] sm:$0xff] }
 0x20c   : > { %v2876_v20 = vpop.f32.mrf.mxu0  ;;  %v2315_v18 = vadd.f32 %v5931_v60, %v5930_v38  ;;  %v2748_v36 = vadd.f32 %v2693_v63, %v2520_v0  ;;  %v5934_v63 = vld [vmem:[#allocation15_spill] sm:$0xff] }
 0x20d   : > { %v2953_v19 = vadd.f32 %v2876_v20, %v2741_v40  ;;  %v3220_v33 = vadd.f32 %v3219_v11, %v3021_v8  ;;  %v3023_v31 = vmax.f32 %v2991_v17, 0.0  ;;  %v2994_v45 = vadd.f32 %v5662_v29, %v2955_v47  ;;  %v4097_v57 = vpop.f32.mrf.mxu1  ;;  %v5932_v40 = vld [vmem:[#allocation4_spill] sm:$0xff]  ;;  %v5933_v17 = vld [vmem:[#allocation18_spill] sm:$0xff] }
 0x20e   : > { %v4123_v21 = vpop.f32.mrf.mxu0  ;;  %v2521_v8 = vadd.f32 %v5932_v40, %v2315_v18  ;;  %v2750_v20 = vadd.f32 %v5717_v25, %v5933_v17 }
 0x20f   : > { %v2992_v10 = vadd.f32 %v5662_v29, %v2953_v19  ;;  %v3221_v49 = vadd.f32 %v3220_v33, %v3022_v61  ;;  %v2958_v32 = vadd.f32 %v4123_v21, %v2746_v24  ;;  %v3026_v22 = vmax.f32 %v2994_v45, 0.0  ;;  %v2709_v7 = vpop.f32.mrf.mxu1  ;;  %v5935_v33 = vld [vmem:[#allocation23_spill] sm:$0xff]  ;;  %v5936_v21 = vld [vmem:[#allocation22_spill] sm:$0xff]  ;;  %v5938_v24 = vld [vmem:[#allocation8_spill] sm:$0xff] }
 0x210   : > { %v2889_v39 = vpop.f32.mrf.mxu0  ;;  %v2318_v47 = vadd.f32 %v5935_v33, %v5934_v63  ;;  %v2751_v1 = vadd.f32 %v4094_v43, %v5936_v21  ;;  %v2749_v30 = vadd.f32 %v2696_v37, %v2521_v8 }
 0x211   : > { %v3024_v58 = vmax.f32 %v2992_v10, 0.0  ;;  %v2956_v23 = vadd.f32 %v2889_v39, %v2744_v15  ;;  %v3222_v46 = vadd.f32 %v3221_v49, %v3023_v31  ;;  %v2997_v13 = vadd.f32 %v5662_v29, %v2958_v32  ;;  %v4098_v15 = vpop.f32.mrf.mxu1  ;;  %v5937_v39 = vld [vmem:[#allocation25_spill] sm:$0xff] }
 0x212   : > { %v4124_v44 = vpop.f32.mrf.mxu0  ;;  %v2524_v5 = vadd.f32 %v5937_v39, %v2318_v47  ;;  %v5941_v32 = vld [vmem:[#allocation13_spill] sm:$0xff] }
 0x213   : > { %v3223_v55 = vadd.f32 %v3222_v46, %v3024_v58  ;;  %v2995_v9 = vadd.f32 %v5662_v29, %v2956_v23  ;;  %v2959_v6 = vadd.f32 %v4124_v44, %v2747_v53  ;;  %v3029_v59 = vmax.f32 %v2997_v13, 0.0  ;;  %v5939_v46 = vld [vmem:[#allocation11_spill] sm:$0xff]  ;;  %v2712_v37 = vpop.f32.mrf.mxu1  ;;  %v5940_v53 = vld [vmem:[#allocation9_spill] sm:$0xff] }
 0x214   : > { %v2892_v51 = vpop.f32.mrf.mxu0  ;;  %v2319_v45 = vadd.f32 %v5939_v46, %v5938_v24  ;;  %v2752_v44 = vadd.f32 %v2709_v7, %v2524_v5 }
 0x215   : > { %v2957_v28 = vadd.f32 %v2892_v51, %v2745_v52  ;;  %v3224_v34 = vadd.f32 %v3223_v55, %v3025_v4  ;;  %v3027_v16 = vmax.f32 %v2995_v9, 0.0  ;;  %v2998_v19 = vadd.f32 %v5662_v29, %v2959_v6 }
 0x216   : > { %v4127_v50 = vpop.f32.mrf.mxu0  ;;  %v2525_v52 = vadd.f32 %v5940_v53, %v2319_v45  ;;  %v2754_v9 = vadd.f32 %v4097_v57, %v5941_v32 }
 0x217   : > { %v2996_v27 = vadd.f32 %v5662_v29, %v2957_v28  ;;  %v3225_v48 = vadd.f32 %v3224_v34, %v3026_v22  ;;  %v2962_v2 = vadd.f32 %v4127_v50, %v2750_v20  ;;  %v3030_v26 = vmax.f32 %v2998_v19, 0.0  ;;  %v5942_v28 = vld [vmem:[#allocation24_spill] sm:$0xff] }
 0x218   : > { %v2905_v3 = vpop.f32.mrf.mxu0  ;;  %v2755_v22 = vadd.f32 %v4098_v15, %v5942_v28  ;;  %v2753_v34 = vadd.f32 %v2712_v37, %v2525_v52 }
 0x219   : > { %v3028_v11 = vmax.f32 %v2996_v27, 0.0  ;;  %v2960_v42 = vadd.f32 %v2905_v3, %v2748_v36  ;;  %v3226_v62 = vadd.f32 %v3225_v48, %v3027_v16  ;;  %v3001_v56 = vadd.f32 %v5662_v29, %v2962_v2 }
 0x21a   : > { %v4128_v61 = vpop.f32.mrf.mxu0 }
 0x21b   : > { %v3227_v10 = vadd.f32 %v3226_v62, %v3028_v11  ;;  %v2999_v31 = vadd.f32 %v5662_v29, %v2960_v42  ;;  %v2963_v23 = vadd.f32 %v4128_v61, %v2751_v1  ;;  %v3033_v6 = vmax.f32 %v3001_v56, 0.0 }
 0x21c   : > { %v2908_v49 = vpop.f32.mrf.mxu0 }
 0x21d   : > { %v2961_v25 = vadd.f32 %v2908_v49, %v2749_v30  ;;  %v3228_v58 = vadd.f32 %v3227_v10, %v3029_v59  ;;  %v3031_v54 = vmax.f32 %v2999_v31, 0.0  ;;  %v3002_v14 = vadd.f32 %v5662_v29, %v2963_v23  ;;  %v3267_v59 = vld [vmem:[%s5795_s4] sm:$0x1] }
 0x21e   : > { %v4131_v41 = vpop.f32.mrf.mxu0 }
 0x21f   : > { %v3000_v43 = vadd.f32 %v5662_v29, %v2961_v25  ;;  %v3229_v35 = vadd.f32 %v3228_v58, %v3030_v26  ;;  %v2966_v38 = vadd.f32 %v4131_v41, %v2754_v9  ;;  %v3034_v27 = vmax.f32 %v3002_v14, 0.0 }
 0x220   : > { %v2921_v12 = vpop.f32.mrf.mxu0  ;;  %v3350_v58 = vlaneseq }
 0x221   : > { %v3032_v4 = vmax.f32 %v3000_v43, 0.0  ;;  %v2964_v55 = vadd.f32 %v2921_v12, %v2752_v44  ;;  %v3230_v51 = vadd.f32 %v3229_v35, %v3031_v54  ;;  %v3005_v57 = vadd.f32 %v5662_v29, %v2966_v38 }
 0x222   : > { %v4132_v0 = vpop.f32.mrf.mxu0  ;;  %v3351_v23 = vand.u32 127, %v3350_v58 }
 0x223   : > { %v3231_v50 = vadd.f32 %v3230_v51, %v3032_v4  ;;  %v3003_v60 = vadd.f32 %v5662_v29, %v2964_v55  ;;  %v2967_v7 = vadd.f32 %v4132_v0, %v2755_v22  ;;  %v3037_v42 = vmax.f32 %v3005_v57, 0.0 }
 0x224   : > { %v2924_v18 = vpop.f32.mrf.mxu0  ;;  %v3352_v41 = vcvt.s32.f32 %v3351_v23 }
 0x225   : > { %v2965_v36 = vadd.f32 %v2924_v18, %v2753_v34  ;;  %v3232_v13 = vadd.f32 %v3231_v50, %v3033_v6  ;;  %v3035_v48 = vmax.f32 %v3003_v60, 0.0  ;;  %v3006_v11 = vadd.f32 %v5662_v29, %v2967_v7 }
 0x227   : > { %v3004_v16 = vadd.f32 %v5662_v29, %v2965_v36  ;;  %v3233_v3 = vadd.f32 %v3232_v13, %v3034_v27  ;;  %v3038_v20 = vmax.f32 %v3006_v11, 0.0 }
 0x229   : > { %v3036_v40 = vmax.f32 %v3004_v16, 0.0  ;;  %v3234_v8 = vadd.f32 %v3233_v3, %v3035_v48 }
 0x22b   : > { %v3235_v17 = vadd.f32 %v3234_v8, %v3036_v40 }
 0x22d   : > { %v3236_v62 = vadd.f32 %v3235_v17, %v3037_v42 }
 0x22f   : > { %v3237_v19 = vadd.f32 %v3236_v62, %v3038_v20 }
 0x231   : > { %v3244_v61 = vrot.slane %v3237_v19, 4 }
 0x233   : > { %v3245_v63 = vadd.f32 %v3244_v61, %v3237_v19 }
 0x235   : > { %v3246_v33 = vrot.slane %v3245_v63, 2 }
 0x237   : > { %v3247_v47 = vadd.f32 %v3246_v33, %v3245_v63 }
 0x239   : > { %v3248_v21 = vrot.slane %v3247_v47, 1 }
 0x23b   : > { %v3249_v1 = vadd.f32 %v3248_v21, %v3247_v47 }
 0x23d   : > { %v3250_v30 = vmul.f32 0.00390625, %v3249_v1 }
 0x23f   : > { %4166 = vmatmul.mubr.f32.vlgmr.msra.gmra.mxu1 %v3250_v30 }
 0x2ff   : > { %v3334_v15 = vpop.f32.mrf.mxu1 }
 0x300   : > { %v3335_v29 = vadd.f32 %v3334_v15, %v3267_v59 }
 0x301   : > { %v4167_v10 = vpop.f32.mrf.mxu1 }
 0x302   : > { %v3339_v2 = vsel %vm3338_vm9, %v3335_v29, -inf }
 0x303   : > { %3340 = vmax.xlane.f32.xlu0 %v3339_v2 }
 0x38c   : > { %v3341_v31 = vpop.xlane.xlu0 %3340 }
 0x38d   : > { %v3342_v49 = vsub.f32 %v3335_v29, %v3341_v31 }
 0x38f   : > { %v3343_v39 = vmul.f32 1.442695, %v3342_v49 }
 0x391   : > { %4225 = vpow2.f32 %v3343_v39 }
 0x39e   : > { %v4226_v5 = vpop.eup %4225 }
 0x39f   : > { %v3345_v25 = vsel %vm3338_vm9, %v4226_v5, 0.0 }
 0x3a0   : > { %3346 = vadd.xlane.f32.xlu0 %v3345_v25 }
 0x429   : > { %v3347_v26 = vpop.xlane.xlu0 %3346 }
 0x42a   : > { %4227 = vrcp.f32 %v3347_v26 }
 0x437   : > { %v4228_v24 = vpop.eup %4227 }
 0x438   : > { %v3349_v46 = vmul.f32 %v4228_v24, %v4226_v5 }
 0x43a   : > { %v3353_v45 = vmul.f32 %v3352_v41, %v3349_v46 }
 0x43c   : > { %v3354_v44 = vsel %vm3338_vm9, %v3353_v45, 0.0 }
 0x43d   : > { %3355 = vadd.xlane.f32.xlu1 %v3354_v44 }
 0x4c6   : > { %v3356_v43 = vpop.xlane.xlu1 %3355 }
 0x4c7   : > { %v3357_v37 = vmax.f32 %v3356_v43, 0.01 }
 0x4c9   : > { %3359 = vst.msk [vmem:[%s246_s15] sm:$0x1] %vm3358_vm10, %v3357_v37 }
 0x4ca PF: > { %s15_s20 = sadd.s32 1, %s4251_s20   ;;  %s5943_s18 = smov %s4247_s19 }
 0x4cb   : > { %p12_p5 = scmp.ge.s32.totalorder %s15_s20, 4   ;;  %s5944_s19 = smov %s5946_s21 }
 0x4cd   :  { %14 = sbr.rel (!%p12_p5) target bundleno = 2 (0x2), region = 86 }

</bundles_post_ra>
